<compile_context>
chip_gen: v6e
topology: v6e:2x2x1
jax: 0.10.0
libtpu: 0.0.40
codegen_flags: <defaults>
</compile_context>

<pallas_src>
import functools

import jax
import jax.numpy as jnp
from jax.experimental import pallas as pl
from jax.experimental.pallas import tpu as pltpu

LANES = 128
SUBLANES = 8
MAX_TILE_BYTES = 4 * 1024 * 1024       # per input, per pipeline buffer
CHUNK_ROWS = 1024                      # in-kernel fold chunk (512 KiB f32)
SMALL_FALLBACK_ELEMS = 65536           # below this, plain XLA is faster
VMEM_LIMIT_BYTES = 48 * 1024 * 1024    # 3 inputs x 2 bufs x 4 MiB + headroom


def _round_up(x, m):
    return ((x + m - 1) // m) * m


def _cdiv(a, b):
    return (a + b - 1) // b


def _wmse_kernel(pred_ref, actual_ref, weight_ref, out_ref, acc_ref, *,
                 rows_valid, row_tile, total_steps, chunk_rows, needs_mask):
    c = pl.program_id(0)       # core-split (parallel) axis
    k = pl.program_id(1)       # sequential row-tile axis
    nk = pl.num_programs(1)

    @pl.when(k == 0)
    def _():
        acc_ref[...] = jnp.zeros_like(acc_ref)

    # Global tile index for this core; on an imbalanced split the trailing
    # steps of the last core are no-ops (their DMA index is clamped).
    step = c * nk + k

    @pl.when(step < total_steps)
    def _():
        row0 = step * row_tile     # global row offset of this tile

        def chunk_sum(r, nrows):
            p = pred_ref[pl.ds(r, nrows), :].astype(jnp.float32)
            a = actual_ref[pl.ds(r, nrows), :].astype(jnp.float32)
            w = weight_ref[pl.ds(r, nrows), :].astype(jnp.float32)
            d = p - a
            wse = w * d * d
            if needs_mask:
                # Tail rows of the final (partial) block hold undefined data;
                # select (not multiply) so NaN/Inf never propagates.
                gr = row0 + r + jax.lax.broadcasted_iota(
                    jnp.int32, (nrows, LANES), 0)
                wse = jnp.where(gr < rows_valid, wse, 0.0)
            # Fold to one (8,128) vreg with element-wise VPU adds only; the
            # expensive cross-lane reduce is deferred to the epilogue.
            return jnp.sum(wse.reshape(-1, SUBLANES, LANES), axis=0)

        acc = jnp.zeros((SUBLANES, LANES), jnp.float32)
        n_full = row_tile // chunk_rows
        if n_full > 0:
            def body(i, a):
                r = pl.multiple_of(i * chunk_rows, chunk_rows)
                return a + chunk_sum(r, chunk_rows)
            acc = jax.lax.fori_loop(0, n_full, body, acc, unroll=True)
        rem = row_tile - n_full * chunk_rows
        if rem > 0:
            acc = acc + chunk_sum(n_full * chunk_rows, rem)

        acc_ref[...] += acc

    @pl.when(k == nk - 1)
    def _():
        out_ref[0, 0] = jnp.sum(acc_ref[...])


def weighted_mse_loss(pred, actual, weight):
    """(weight * (pred - actual) ** 2).sum() — computed in a Pallas TPU kernel."""
    assert pred.shape == actual.shape == weight.shape
    out_dtype = jnp.result_type(pred.dtype, actual.dtype, weight.dtype)

    n = 1
    for s in pred.shape:
        n *= s
    if n == 0:
        return jnp.zeros((), out_dtype)

    if n < SMALL_FALLBACK_ELEMS:
        # Launch + pipeline overhead dominates for tiny inputs.
        d = pred.astype(jnp.float32) - actual.astype(jnp.float32)
        return jnp.sum(weight.astype(jnp.float32) * d * d).astype(out_dtype)

    itemsize = jnp.dtype(pred.dtype).itemsize
    pack = max(1, 4 // itemsize)           # sublane packing vs f32
    row_align = SUBLANES * pack            # 8 f32 / 16 bf16 / 32 int8
    max_row_tile = (MAX_TILE_BYTES // (LANES * itemsize)) // row_align * row_align

    # Minimal zero-pad: only up to the next (row_align x 128)-element boundary.
    n_pad = _round_up(n, row_align * LANES)

    def to_2d(x):
        flat = x.reshape(-1)                       # free reshape, native dtype
        if n_pad > n:
            flat = jnp.pad(flat, (0, n_pad - n))   # only when misaligned
        return flat.reshape(n_pad // LANES, LANES)

    rows = n_pad // LANES
    row_tile = rows if rows <= max_row_tile else max_row_tile
    total_steps = _cdiv(rows, row_tile)
    needs_mask = (rows % row_tile) != 0            # partial final block?

    # Split the sequential tile range across TensorCores (2 on v7x). On
    # single-core v5e/v6e the two halves simply run back-to-back.
    num_splits = 2 if total_steps >= 2 else 1
    steps_per_split = _cdiv(total_steps, num_splits)

    p2d = to_2d(pred)
    a2d = to_2d(actual)
    w2d = to_2d(weight)

    def in_map(c, k):
        # Clamp so an imbalanced last core never DMAs past the final block;
        # the kernel skips accumulation for those steps.
        return (jnp.minimum(c * steps_per_split + k, total_steps - 1), 0)

    tile_spec = pl.BlockSpec((row_tile, LANES), in_map)
    kernel = functools.partial(
        _wmse_kernel,
        rows_valid=rows,
        row_tile=row_tile,
        total_steps=total_steps,
        chunk_rows=CHUNK_ROWS,
        needs_mask=needs_mask,
    )

    partials = pl.pallas_call(
        kernel,
        out_shape=jax.ShapeDtypeStruct((num_splits, 1), jnp.float32),
        grid_spec=pltpu.PrefetchScalarGridSpec(
            num_scalar_prefetch=0,
            grid=(num_splits, steps_per_split),
            in_specs=[tile_spec, tile_spec, tile_spec],
            out_specs=pl.BlockSpec(
                (1, 1), lambda c, k: (c, 0), memory_space=pltpu.SMEM
            ),
            scratch_shapes=[pltpu.VMEM((SUBLANES, LANES), jnp.float32)],
        ),
        compiler_params=pltpu.CompilerParams(
            dimension_semantics=("parallel", "arbitrary"),
            vmem_limit_bytes=VMEM_LIMIT_BYTES,
        ),
    )(p2d, a2d, w2d)

    return jnp.sum(partials).astype(out_dtype)


if __name__ == "__main__":
    key = jax.random.PRNGKey(0)
    k1, k2, k3 = jax.random.split(key, 3)

    def make(shape, dtype=jnp.float32):
        return (jax.random.normal(k1, shape, dtype=dtype),
                jax.random.normal(k2, shape, dtype=dtype),
                jax.random.uniform(k3, shape, dtype=dtype))

    def ref_loss(p, a, w):
        d = p.astype(jnp.float32) - a.astype(jnp.float32)
        return jnp.sum(w.astype(jnp.float32) * d * d)

    # 1) Tiny NCHW-style example (small-input fallback path).
    p, a, w = make((2, 4, 16, 16))
    loss = weighted_mse_loss(p, a, w)
    jax.block_until_ready(loss)
    assert jnp.allclose(loss, ref_loss(p, a, w), rtol=1e-5, atol=1e-5), loss

    # 2) Non-128-aligned element count -> Pallas kernel, single full-array
    #    block, minimal (<1024-element) zero pad.
    p, a, w = make((3, 5, 66, 129))
    loss = weighted_mse_loss(p, a, w)
    jax.block_until_ready(loss)
    assert jnp.allclose(loss, ref_loss(p, a, w), rtol=1e-4), loss

    # 3) Larger, already tile-aligned count -> multi-tile grid with a partial
    #    final block (in-kernel row mask), imbalanced 2-way core split
    #    (clamped index map), no wrapper-side padding at all.
    p, a, w = make((2, 4, 2500, 128))
    loss = weighted_mse_loss(p, a, w)
    jax.block_until_ready(loss)
    assert jnp.allclose(loss, ref_loss(p, a, w), rtol=1e-4), loss

    print("KERNEL_OK")
</pallas_src>

<mosaic_0001>
module attributes {stable_mosaic.version = 11 : i64} {
  func.func @_wmse_kernel(%arg0: i32, %arg1: i32, %arg2: memref<1000x128xf32, #tpu.memory_space<vmem>>, %arg3: memref<1000x128xf32, #tpu.memory_space<vmem>>, %arg4: memref<1000x128xf32, #tpu.memory_space<vmem>>, %arg5: memref<1x1xf32, #tpu.memory_space<smem>>, %arg6: memref<8x128xf32, #tpu.memory_space<vmem>>) attributes {dimension_semantics = [#tpu.dimension_semantics<parallel>, #tpu.dimension_semantics<arbitrary>], iteration_bounds = array<i64: 1, 1>, scalar_prefetch = 0 : i64, scratch_operands = 1 : i64, tpu.core_type = #tpu.core_type<tc>, window_params = [{transform_indices = @transform_0, window_bounds = array<i64: 1000, 128>}, {transform_indices = @transform_1, window_bounds = array<i64: 1000, 128>}, {transform_indices = @transform_2, window_bounds = array<i64: 1000, 128>}, {transform_indices = @transform_3, window_bounds = array<i64: 1, 1>}]} {
    %c0_i32 = arith.constant 0 : i32
    %0 = arith.cmpi eq, %arg1, %c0_i32 : i32
    %1 = arith.extui %0 : i1 to i32
    %c0_i32_0 = arith.constant 0 : i32
    %2 = arith.cmpi ne, %1, %c0_i32_0 : i32
    scf.if %2 {
      %cst = arith.constant 0.000000e+00 : f32
      %11 = vector.broadcast %cst : f32 to vector<8x128xf32>
      %c0 = arith.constant 0 : index
      %c0_5 = arith.constant 0 : index
      %12 = vector.load %arg6[%c0, %c0_5] : memref<8x128xf32, #tpu.memory_space<vmem>>, vector<8x128xf32>
      tpu.vector_store %arg6[%c0, %c0_5], %11 {strides = array<i32>} : memref<8x128xf32, #tpu.memory_space<vmem>>, vector<8x128xf32>,
    } else {
    }
    %c1_i32 = arith.constant 1 : i32
    %3 = arith.muli %arg0, %c1_i32 : i32
    %4 = arith.addi %3, %arg1 : i32
    %c1_i32_1 = arith.constant 1 : i32
    %5 = arith.cmpi slt, %4, %c1_i32_1 : i32
    %6 = arith.extui %5 : i1 to i32
    %c0_i32_2 = arith.constant 0 : i32
    %7 = arith.cmpi ne, %6, %c0_i32_2 : i32
    scf.if %7 {
      %cst = arith.constant 0.000000e+00 : f32
      %11 = vector.broadcast %cst : f32 to vector<8x128xf32>
      %c0 = arith.constant 0 : index
      %c0_5 = arith.constant 0 : index
      %12 = vector.load %arg2[%c0, %c0_5] : memref<1000x128xf32, #tpu.memory_space<vmem>>, vector<1000x128xf32>
      %c0_6 = arith.constant 0 : index
      %c0_7 = arith.constant 0 : index
      %13 = vector.load %arg3[%c0_6, %c0_7] : memref<1000x128xf32, #tpu.memory_space<vmem>>, vector<1000x128xf32>
      %c0_8 = arith.constant 0 : index
      %c0_9 = arith.constant 0 : index
      %14 = vector.load %arg4[%c0_8, %c0_9] : memref<1000x128xf32, #tpu.memory_space<vmem>>, vector<1000x128xf32>
      %15 = arith.subf %12, %13 : vector<1000x128xf32>
      %16 = arith.mulf %14, %15 : vector<1000x128xf32>
      %17 = arith.mulf %16, %15 : vector<1000x128xf32>
      %18 = vector.shape_cast %17 : vector<1000x128xf32> to vector<125x8x128xf32>
      %cst_10 = arith.constant dense<0.000000e+00> : vector<8x128xf32>
      %19 = vector.multi_reduction <add>, %18, %cst_10 [0] : vector<125x8x128xf32> to vector<8x128xf32>
      %20 = arith.addf %11, %19 : vector<8x128xf32>
      %c0_11 = arith.constant 0 : index
      %c0_12 = arith.constant 0 : index
      %21 = vector.load %arg6[%c0_11, %c0_12] : memref<8x128xf32, #tpu.memory_space<vmem>>, vector<8x128xf32>
      %22 = arith.addf %21, %20 : vector<8x128xf32>
      %c0_13 = arith.constant 0 : index
      %c0_14 = arith.constant 0 : index
      %23 = vector.load %arg6[%c0_13, %c0_14] : memref<8x128xf32, #tpu.memory_space<vmem>>, vector<8x128xf32>
      tpu.vector_store %arg6[%c0_13, %c0_14], %22 {strides = array<i32>} : memref<8x128xf32, #tpu.memory_space<vmem>>, vector<8x128xf32>,
    } else {
    }
    %c0_i32_3 = arith.constant 0 : i32
    %8 = arith.cmpi eq, %arg1, %c0_i32_3 : i32
    %9 = arith.extui %8 : i1 to i32
    %c0_i32_4 = arith.constant 0 : i32
    %10 = arith.cmpi ne, %9, %c0_i32_4 : i32
    scf.if %10 {
      %c0 = arith.constant 0 : index
      %c0_5 = arith.constant 0 : index
      %11 = vector.load %arg6[%c0, %c0_5] : memref<8x128xf32, #tpu.memory_space<vmem>>, vector<8x128xf32>
      %12 = vector.shape_cast %11 : vector<8x128xf32> to vector<1x8x128xf32>
      %cst = arith.constant dense<0.000000e+00> : vector<1xf32>
      %13 = vector.multi_reduction <add>, %12, %cst [1, 2] : vector<1x8x128xf32> to vector<1xf32>
      %14 = vector.shape_cast %13 : vector<1xf32> to vector<1x1x1xf32>
      %15 = vector.extract %14[0, 0, 0] : f32 from vector<1x1x1xf32>
      %c0_6 = arith.constant 0 : index
      %c0_7 = arith.constant 0 : index
      %16 = memref.load %arg5[%c0_6, %c0_7] : memref<1x1xf32, #tpu.memory_space<smem>>
      memref.store %15, %arg5[%c0_6, %c0_7] : memref<1x1xf32, #tpu.memory_space<smem>>
    } else {
    }
    return
  }
  func.func @transform_0(%arg0: i32, %arg1: i32) -> (i32, i32) {
    %c1_i32 = arith.constant 1 : i32
    %0 = arith.muli %arg0, %c1_i32 : i32
    %1 = arith.addi %0, %arg1 : i32
    %c0_i32 = arith.constant 0 : i32
    %2 = arith.minsi %1, %c0_i32 : i32
    %c0_i32_0 = arith.constant 0 : i32
    %c0_i32_1 = arith.constant 0 : i32
    return %2, %c0_i32_0 : i32, i32
  }
  func.func @transform_1(%arg0: i32, %arg1: i32) -> (i32, i32) {
    %c1_i32 = arith.constant 1 : i32
    %0 = arith.muli %arg0, %c1_i32 : i32
    %1 = arith.addi %0, %arg1 : i32
    %c0_i32 = arith.constant 0 : i32
    %2 = arith.minsi %1, %c0_i32 : i32
    %c0_i32_0 = arith.constant 0 : i32
    %c0_i32_1 = arith.constant 0 : i32
    return %2, %c0_i32_0 : i32, i32
  }
  func.func @transform_2(%arg0: i32, %arg1: i32) -> (i32, i32) {
    %c1_i32 = arith.constant 1 : i32
    %0 = arith.muli %arg0, %c1_i32 : i32
    %1 = arith.addi %0, %arg1 : i32
    %c0_i32 = arith.constant 0 : i32
    %2 = arith.minsi %1, %c0_i32 : i32
    %c0_i32_0 = arith.constant 0 : i32
    %c0_i32_1 = arith.constant 0 : i32
    return %2, %c0_i32_0 : i32, i32
  }
  func.func @transform_3(%arg0: i32, %arg1: i32) -> (i32, i32) {
    %c0_i32 = arith.constant 0 : i32
    %c0_i32_0 = arith.constant 0 : i32
    return %arg0, %c0_i32 : i32, i32
  }
}

</mosaic_0001>

<bundles_post_ra>
// kernel: tpu_custom_call.1
= control target key start
LH: loop header
LB: loop body
LE: loop exit
PB: predicated region body
PF: predicated region fallthrough
CT: control target
= control target key end

     0   :  { %8 = vsyncpa [#allocation4], 0  ;;  %s1130_s0 = inlined_call_operand.hbm [shape: f32[1000,128], index: 0, kind: input, shape index: {}]   ;;  %s1131_s1 = inlined_call_operand.hbm [shape: f32[1000,128], index: 1, kind: input, shape index: {}]   ;;  %s1132_s2 = inlined_call_operand.hbm [shape: f32[1000,128], index: 2, kind: input, shape index: {}]   ;;  %s1133_s3 = inlined_call_operand.hbm [shape: f32[1,1], index: 3, kind: output, shape index: {}]  }
   0x1   :  { %9 = vsyncpa [#allocation7], 0 }
   0x2   :  { %10 = vsyncpa [#allocation5], 0  ;;  %s1092_s12 = smov [#allocation6]   ;;  %s1093_s14 = smov [#allocation3]  }
   0x3   :  { %s40_s13 = sshll.u32 %s1092_s12, 4  ;;  %s22_s15 = sshll.u32 %s1093_s14, 4  ;;  %s41_s13 = int_to_ptr.vmem [resolvable:$true] %s40_s13  ;;  %s23_s15 = int_to_ptr.vmem [resolvable:$true] %s22_s15 }
   0x4   :  { %s1026_s16 = scalar_lea.vmem %s41_s13, 16000  ;;  %p1031_p1 = scmp.lt.s32.totalorder %s41_s13, %s41_s13 }
   0x5   :  { %p1027_p0 = scmp.ne.s32.totalorder %s41_s13, %s1026_s16  ;;  %p1032_p2 = scmp.lt.s32.totalorder %s1026_s16, %s1026_s16 }
   0x7   :  { %p1033_p3 = por %p1032_p2, %p1031_p1 }
   0x9   :  { %p1034_p4 = pnand %p1033_p3, %p1027_p0 }
   0xb   :  { %1037 = shalt.err (!%p1034_p4)
}
   0xc   :  { %s1094_s17 = smov 128   ;;  %s1095_s18 = smov 8  }
   0xd   :  { %46 = dma.hbm_to_vmem [thread:$0]  %s1131_s1, 16000, %s41_s13, [#allocation7], %s1094_s17, %s1094_s17, %s1095_s18  }
   0xe   :  { %s1046_s21 = scalar_lea.vmem %s23_s15, 16000  ;;  %p1051_p6 = scmp.lt.s32.totalorder %s23_s15, %s23_s15 }
   0xf   :  { %p1047_p5 = scmp.ne.s32.totalorder %s23_s15, %s1046_s21  ;;  %p1052_p7 = scmp.lt.s32.totalorder %s1046_s21, %s1046_s21 }
  0x11   :  { %p1053_p8 = por %p1052_p7, %p1051_p6 }
  0x13   :  { %p1054_p9 = pnand %p1053_p8, %p1047_p5 }
  0x15   :  { %1057 = shalt.err (!%p1054_p9)
}
  0x16   :  { %28 = dma.hbm_to_vmem [thread:$0]  %s1130_s0, 16000, %s23_s15, [#allocation4], %s1094_s17, %s1094_s17, %s1095_s18  }
  0x17   :  { %s1096_s24 = smov [#allocation8]  }
  0x18   :  { %s58_s25 = sshll.u32 %s1096_s24, 4  ;;  %s59_s25 = int_to_ptr.vmem [resolvable:$true] %s58_s25 }
  0x19   :  { %s1066_s26 = scalar_lea.vmem %s59_s25, 16000  ;;  %p1071_p11 = scmp.lt.s32.totalorder %s59_s25, %s59_s25 }
  0x1a   :  { %p1067_p10 = scmp.ne.s32.totalorder %s59_s25, %s1066_s26  ;;  %p1072_p12 = scmp.lt.s32.totalorder %s1066_s26, %s1066_s26 }
  0x1c   :  { %p1073_p13 = por %p1072_p12, %p1071_p11 }
  0x1e   :  { %p1074_p0 = pnand %p1073_p13, %p1067_p10 }
  0x20   :  { %1077 = shalt.err (!%p1074_p0)
}
  0x21   :  { %64 = dma.hbm_to_vmem [thread:$0]  %s1132_s2, 16000, %s59_s25, [#allocation7], %s1094_s17, %s1094_s17, %s1095_s18  }
  0x22   :  { %1086 = dma.done.wait [#allocation4], 16000  }
  0x23   :  { %1087 = vsyncadd [#allocation4], 4294951296 }
  0x24   :  { %1088 = dma.done.wait [#allocation7], 32000  }
  0x25   :  { %1089 = vsyncadd [#allocation7], 4294935296  ;;  %v96_v0 = vld [vmem:[#allocation3] sm:$0xff]  ;;  %v97_v1 = vld [vmem:[#allocation3 + $0x8] sm:$0xff]  ;;  %s1097_s2 = smov [#allocation9]  }
  0x26   :  { %v221_v2 = vld [vmem:[#allocation6] sm:$0xff]  ;;  %v222_v3 = vld [vmem:[#allocation6 + $0x8] sm:$0xff]  ;;  %v223_v5 = vld [vmem:[#allocation6 + $0x10] sm:$0xff] }
  0x27   :  { %v98_v4 = vld [vmem:[#allocation3 + $0x10] sm:$0xff]  ;;  %v99_v6 = vld [vmem:[#allocation3 + $0x18] sm:$0xff]  ;;  %v471_v7 = vsub.f32 %v96_v0, %v221_v2  ;;  %v472_v8 = vsub.f32 %v97_v1, %v222_v3  ;;  %v224_v9 = vld [vmem:[#allocation6 + $0x18] sm:$0xff] }
  0x28   :  { %v346_v10 = vld [vmem:[#allocation8] sm:$0xff]  ;;  %v347_v11 = vld [vmem:[#allocation8 + $0x8] sm:$0xff]  ;;  %v473_v12 = vsub.f32 %v98_v4, %v223_v5  ;;  %v100_v13 = vld [vmem:[#allocation3 + $0x20] sm:$0xff]  ;;  %v474_v16 = vsub.f32 %v99_v6, %v224_v9 }
  0x29   :  { %v225_v14 = vld [vmem:[#allocation6 + $0x20] sm:$0xff]  ;;  %v348_v15 = vld [vmem:[#allocation8 + $0x10] sm:$0xff]  ;;  %v596_v17 = vmul.f32 %v471_v7, %v346_v10  ;;  %v597_v18 = vmul.f32 %v472_v8, %v347_v11  ;;  %v226_v20 = vld [vmem:[#allocation6 + $0x28] sm:$0xff] }
  0x2a   :  { %v101_v19 = vld [vmem:[#allocation3 + $0x28] sm:$0xff]  ;;  %v475_v22 = vsub.f32 %v100_v13, %v225_v14  ;;  %v598_v23 = vmul.f32 %v473_v12, %v348_v15  ;;  %v102_v24 = vld [vmem:[#allocation3 + $0x30] sm:$0xff]  ;;  %v227_v25 = vld [vmem:[#allocation6 + $0x30] sm:$0xff] }
  0x2b   :  { %v349_v21 = vld [vmem:[#allocation8 + $0x18] sm:$0xff]  ;;  %v350_v26 = vld [vmem:[#allocation8 + $0x20] sm:$0xff]  ;;  %v476_v27 = vsub.f32 %v101_v19, %v226_v20  ;;  %v721_v29 = vmul.f32 %v596_v17, %v471_v7  ;;  %v722_v30 = vmul.f32 %v597_v18, %v472_v8  ;;  %v103_v31 = vld [vmem:[#allocation3 + $0x38] sm:$0xff]  ;;  %v477_v34 = vsub.f32 %v102_v24, %v227_v25 }
  0x2c   :  { %v599_v28 = vmul.f32 %v474_v16, %v349_v21  ;;  %v228_v32 = vld [vmem:[#allocation6 + $0x38] sm:$0xff]  ;;  %v351_v33 = vld [vmem:[#allocation8 + $0x28] sm:$0xff]  ;;  %v600_v35 = vmul.f32 %v475_v22, %v350_v26  ;;  %v723_v36 = vmul.f32 %v598_v23, %v473_v12  ;;  %v229_v38 = vld [vmem:[#allocation6 + $0x40] sm:$0xff] }
  0x2d   :  { %v104_v37 = vld [vmem:[#allocation3 + $0x40] sm:$0xff]  ;;  %v478_v40 = vsub.f32 %v103_v31, %v228_v32  ;;  %v601_v41 = vmul.f32 %v476_v27, %v351_v33  ;;  %v846_v43 = vadd.f32 %v722_v30, %v721_v29  ;;  %v105_v44 = vld [vmem:[#allocation3 + $0x48] sm:$0xff]  ;;  %v230_v45 = vld [vmem:[#allocation6 + $0x48] sm:$0xff] }
  0x2e   :  { %v352_v39 = vld [vmem:[#allocation8 + $0x30] sm:$0xff]  ;;  %v724_v42 = vmul.f32 %v599_v28, %v474_v16  ;;  %v353_v46 = vld [vmem:[#allocation8 + $0x38] sm:$0xff]  ;;  %v479_v47 = vsub.f32 %v104_v37, %v229_v38  ;;  %v725_v49 = vmul.f32 %v600_v35, %v475_v22  ;;  %v106_v51 = vld [vmem:[#allocation3 + $0x50] sm:$0xff]  ;;  %v480_v54 = vsub.f32 %v105_v44, %v230_v45 }
  0x2f   :  { %v602_v48 = vmul.f32 %v477_v34, %v352_v39  ;;  %v847_v50 = vadd.f32 %v846_v43, %v723_v36  ;;  %v231_v52 = vld [vmem:[#allocation6 + $0x50] sm:$0xff]  ;;  %v354_v53 = vld [vmem:[#allocation8 + $0x40] sm:$0xff]  ;;  %v603_v55 = vmul.f32 %v478_v40, %v353_v46  ;;  %v726_v56 = vmul.f32 %v601_v41, %v476_v27  ;;  %v232_v59 = vld [vmem:[#allocation6 + $0x58] sm:$0xff] }
  0x30   :  { %v107_v58 = vld [vmem:[#allocation3 + $0x58] sm:$0xff]  ;;  %v481_v61 = vsub.f32 %v106_v51, %v231_v52  ;;  %v604_v62 = vmul.f32 %v479_v47, %v354_v53  ;;  %v108_v1 = vld [vmem:[#allocation3 + $0x60] sm:$0xff]  ;;  %v233_v2 = vld [vmem:[#allocation6 + $0x60] sm:$0xff] }
  0x31   :  { %v848_v57 = vadd.f32 %v847_v50, %v724_v42  ;;  %v355_v60 = vld [vmem:[#allocation8 + $0x48] sm:$0xff]  ;;  %v727_v63 = vmul.f32 %v602_v48, %v477_v34  ;;  %v356_v3 = vld [vmem:[#allocation8 + $0x50] sm:$0xff]  ;;  %v482_v4 = vsub.f32 %v107_v58, %v232_v59  ;;  %v728_v6 = vmul.f32 %v603_v55, %v478_v40  ;;  %v109_v8 = vld [vmem:[#allocation3 + $0x68] sm:$0xff] }
  0x32   :  { %v605_v5 = vmul.f32 %v480_v54, %v355_v60  ;;  %v234_v9 = vld [vmem:[#allocation6 + $0x68] sm:$0xff]  ;;  %v357_v10 = vld [vmem:[#allocation8 + $0x58] sm:$0xff]  ;;  %v483_v11 = vsub.f32 %v108_v1, %v233_v2  ;;  %v606_v12 = vmul.f32 %v481_v61, %v356_v3  ;;  %v729_v13 = vmul.f32 %v604_v62, %v479_v47  ;;  %v235_v16 = vld [vmem:[#allocation6 + $0x70] sm:$0xff] }
  0x33   :  { %v849_v0 = vadd.f32 %v848_v57, %v725_v49  ;;  %v110_v15 = vld [vmem:[#allocation3 + $0x70] sm:$0xff]  ;;  %v484_v18 = vsub.f32 %v109_v8, %v234_v9  ;;  %v607_v19 = vmul.f32 %v482_v4, %v357_v10  ;;  %v111_v22 = vld [vmem:[#allocation3 + $0x78] sm:$0xff]  ;;  %v236_v23 = vld [vmem:[#allocation6 + $0x78] sm:$0xff] }
  0x34   :  { %v358_v17 = vld [vmem:[#allocation8 + $0x60] sm:$0xff]  ;;  %v730_v20 = vmul.f32 %v605_v5, %v480_v54  ;;  %v359_v24 = vld [vmem:[#allocation8 + $0x68] sm:$0xff]  ;;  %v485_v25 = vsub.f32 %v110_v15, %v235_v16  ;;  %v731_v27 = vmul.f32 %v606_v12, %v481_v61  ;;  %v112_v29 = vld [vmem:[#allocation3 + $0x80] sm:$0xff]  ;;  %v486_v32 = vsub.f32 %v111_v22, %v236_v23 }
  0x35   :  { %v850_v7 = vadd.f32 %v849_v0, %v726_v56  ;;  %v608_v26 = vmul.f32 %v483_v11, %v358_v17  ;;  %v237_v30 = vld [vmem:[#allocation6 + $0x80] sm:$0xff]  ;;  %v360_v31 = vld [vmem:[#allocation8 + $0x70] sm:$0xff]  ;;  %v609_v33 = vmul.f32 %v484_v18, %v359_v24  ;;  %v732_v34 = vmul.f32 %v607_v19, %v482_v4  ;;  %v238_v37 = vld [vmem:[#allocation6 + $0x88] sm:$0xff] }
  0x36   :  { %v113_v36 = vld [vmem:[#allocation3 + $0x88] sm:$0xff]  ;;  %v487_v39 = vsub.f32 %v112_v29, %v237_v30  ;;  %v610_v40 = vmul.f32 %v485_v25, %v360_v31  ;;  %v114_v43 = vld [vmem:[#allocation3 + $0x90] sm:$0xff]  ;;  %v239_v44 = vld [vmem:[#allocation6 + $0x90] sm:$0xff] }
  0x37   :  { %v851_v14 = vadd.f32 %v850_v7, %v727_v63  ;;  %v361_v38 = vld [vmem:[#allocation8 + $0x78] sm:$0xff]  ;;  %v733_v41 = vmul.f32 %v608_v26, %v483_v11  ;;  %v362_v45 = vld [vmem:[#allocation8 + $0x80] sm:$0xff]  ;;  %v488_v46 = vsub.f32 %v113_v36, %v238_v37  ;;  %v734_v48 = vmul.f32 %v609_v33, %v484_v18  ;;  %v115_v50 = vld [vmem:[#allocation3 + $0x98] sm:$0xff] }
  0x38   :  { %v611_v47 = vmul.f32 %v486_v32, %v361_v38  ;;  %v240_v51 = vld [vmem:[#allocation6 + $0x98] sm:$0xff]  ;;  %v363_v52 = vld [vmem:[#allocation8 + $0x88] sm:$0xff]  ;;  %v489_v53 = vsub.f32 %v114_v43, %v239_v44  ;;  %v612_v54 = vmul.f32 %v487_v39, %v362_v45  ;;  %v735_v55 = vmul.f32 %v610_v40, %v485_v25  ;;  %v241_v58 = vld [vmem:[#allocation6 + $0xa0] sm:$0xff] }
  0x39   :  { %v852_v21 = vadd.f32 %v851_v14, %v728_v6  ;;  %v116_v57 = vld [vmem:[#allocation3 + $0xa0] sm:$0xff]  ;;  %v490_v60 = vsub.f32 %v115_v50, %v240_v51  ;;  %v613_v61 = vmul.f32 %v488_v46, %v363_v52  ;;  %v117_v0 = vld [vmem:[#allocation3 + $0xa8] sm:$0xff]  ;;  %v242_v1 = vld [vmem:[#allocation6 + $0xa8] sm:$0xff] }
  0x3a   :  { %v364_v59 = vld [vmem:[#allocation8 + $0x90] sm:$0xff]  ;;  %v736_v62 = vmul.f32 %v611_v47, %v486_v32  ;;  %v365_v2 = vld [vmem:[#allocation8 + $0x98] sm:$0xff]  ;;  %v491_v3 = vsub.f32 %v116_v57, %v241_v58  ;;  %v737_v5 = vmul.f32 %v612_v54, %v487_v39  ;;  %v118_v7 = vld [vmem:[#allocation3 + $0xb0] sm:$0xff]  ;;  %v492_v10 = vsub.f32 %v117_v0, %v242_v1 }
  0x3b   :  { %v853_v28 = vadd.f32 %v852_v21, %v729_v13  ;;  %v614_v4 = vmul.f32 %v489_v53, %v364_v59  ;;  %v243_v8 = vld [vmem:[#allocation6 + $0xb0] sm:$0xff]  ;;  %v366_v9 = vld [vmem:[#allocation8 + $0xa0] sm:$0xff]  ;;  %v615_v11 = vmul.f32 %v490_v60, %v365_v2  ;;  %v738_v12 = vmul.f32 %v613_v61, %v488_v46  ;;  %v244_v15 = vld [vmem:[#allocation6 + $0xb8] sm:$0xff] }
  0x3c   :  { %v119_v14 = vld [vmem:[#allocation3 + $0xb8] sm:$0xff]  ;;  %v493_v17 = vsub.f32 %v118_v7, %v243_v8  ;;  %v616_v18 = vmul.f32 %v491_v3, %v366_v9  ;;  %v120_v21 = vld [vmem:[#allocation3 + $0xc0] sm:$0xff]  ;;  %v245_v22 = vld [vmem:[#allocation6 + $0xc0] sm:$0xff] }
  0x3d   :  { %v854_v35 = vadd.f32 %v853_v28, %v730_v20  ;;  %v367_v16 = vld [vmem:[#allocation8 + $0xa8] sm:$0xff]  ;;  %v739_v19 = vmul.f32 %v614_v4, %v489_v53  ;;  %v368_v23 = vld [vmem:[#allocation8 + $0xb0] sm:$0xff]  ;;  %v494_v24 = vsub.f32 %v119_v14, %v244_v15  ;;  %v740_v26 = vmul.f32 %v615_v11, %v490_v60  ;;  %v121_v28 = vld [vmem:[#allocation3 + $0xc8] sm:$0xff] }
  0x3e   :  { %v617_v25 = vmul.f32 %v492_v10, %v367_v16  ;;  %v246_v29 = vld [vmem:[#allocation6 + $0xc8] sm:$0xff]  ;;  %v369_v30 = vld [vmem:[#allocation8 + $0xb8] sm:$0xff]  ;;  %v495_v31 = vsub.f32 %v120_v21, %v245_v22  ;;  %v618_v32 = vmul.f32 %v493_v17, %v368_v23  ;;  %v741_v33 = vmul.f32 %v616_v18, %v491_v3  ;;  %v247_v36 = vld [vmem:[#allocation6 + $0xd0] sm:$0xff] }
  0x3f   :  { %v855_v42 = vadd.f32 %v854_v35, %v731_v27  ;;  %v122_v35 = vld [vmem:[#allocation3 + $0xd0] sm:$0xff]  ;;  %v496_v38 = vsub.f32 %v121_v28, %v246_v29  ;;  %v619_v39 = vmul.f32 %v494_v24, %v369_v30  ;;  %v248_v43 = vld [vmem:[#allocation6 + $0xd8] sm:$0xff]  ;;  %v371_v44 = vld [vmem:[#allocation8 + $0xc8] sm:$0xff] }
  0x40   :  { %v370_v37 = vld [vmem:[#allocation8 + $0xc0] sm:$0xff]  ;;  %v742_v40 = vmul.f32 %v617_v25, %v492_v10  ;;  %v497_v45 = vsub.f32 %v122_v35, %v247_v36  ;;  %v743_v47 = vmul.f32 %v618_v32, %v493_v17  ;;  %v249_v50 = vld [vmem:[#allocation6 + $0xe0] sm:$0xff]  ;;  %v372_v51 = vld [vmem:[#allocation8 + $0xd0] sm:$0xff] }
  0x41   :  { %v856_v49 = vadd.f32 %v855_v42, %v732_v34  ;;  %v123_v42 = vld [vmem:[#allocation3 + $0xd8] sm:$0xff]  ;;  %v620_v46 = vmul.f32 %v495_v31, %v370_v37  ;;  %v621_v53 = vmul.f32 %v496_v38, %v371_v44  ;;  %v744_v54 = vmul.f32 %v619_v39, %v494_v24  ;;  %v250_v57 = vld [vmem:[#allocation6 + $0xe8] sm:$0xff]  ;;  %v373_v58 = vld [vmem:[#allocation8 + $0xd8] sm:$0xff] }
  0x42   :  { %v498_v52 = vsub.f32 %v123_v42, %v248_v43  ;;  %v622_v60 = vmul.f32 %v497_v45, %v372_v51  ;;  %v251_v0 = vld [vmem:[#allocation6 + $0xf0] sm:$0xff]  ;;  %v374_v1 = vld [vmem:[#allocation8 + $0xe0] sm:$0xff]  ;;  %v252_v7 = vld [vmem:[#allocation6 + $0xf8] sm:$0xff] }
  0x43   :  { %v857_v56 = vadd.f32 %v856_v49, %v733_v41  ;;  %v124_v49 = vld [vmem:[#allocation3 + $0xe0] sm:$0xff]  ;;  %v745_v61 = vmul.f32 %v620_v46, %v495_v31  ;;  %v746_v4 = vmul.f32 %v621_v53, %v496_v38  ;;  %v375_v8 = vld [vmem:[#allocation8 + $0xe8] sm:$0xff]  ;;  %v253_v14 = vld [vmem:[#allocation6 + $0x100] sm:$0xff] }
  0x44   :  { %v499_v59 = vsub.f32 %v124_v49, %v249_v50  ;;  %v623_v3 = vmul.f32 %v498_v52, %v373_v58  ;;  %v747_v11 = vmul.f32 %v622_v60, %v497_v45  ;;  %v376_v15 = vld [vmem:[#allocation8 + $0xf0] sm:$0xff]  ;;  %v254_v21 = vld [vmem:[#allocation6 + $0x108] sm:$0xff]  ;;  %v377_v22 = vld [vmem:[#allocation8 + $0xf8] sm:$0xff] }
  0x45   :  { %v858_v63 = vadd.f32 %v857_v56, %v734_v48  ;;  %v125_v56 = vld [vmem:[#allocation3 + $0xe8] sm:$0xff]  ;;  %v255_v28 = vld [vmem:[#allocation6 + $0x110] sm:$0xff]  ;;  %v378_v29 = vld [vmem:[#allocation8 + $0x100] sm:$0xff] }
  0x46   :  { %v500_v2 = vsub.f32 %v125_v56, %v250_v57  ;;  %v624_v10 = vmul.f32 %v499_v59, %v374_v1  ;;  %v748_v18 = vmul.f32 %v623_v3, %v498_v52  ;;  %v256_v35 = vld [vmem:[#allocation6 + $0x118] sm:$0xff]  ;;  %v379_v36 = vld [vmem:[#allocation8 + $0x108] sm:$0xff]  ;;  %v257_v42 = vld [vmem:[#allocation6 + $0x120] sm:$0xff] }
  0x47   :  { %v859_v6 = vadd.f32 %v858_v63, %v735_v55  ;;  %v126_v63 = vld [vmem:[#allocation3 + $0xf0] sm:$0xff]  ;;  %v380_v43 = vld [vmem:[#allocation8 + $0x110] sm:$0xff]  ;;  %v381_v50 = vld [vmem:[#allocation8 + $0x118] sm:$0xff] }
  0x48   :  { %v501_v9 = vsub.f32 %v126_v63, %v251_v0  ;;  %v625_v17 = vmul.f32 %v500_v2, %v375_v8  ;;  %v749_v25 = vmul.f32 %v624_v10, %v499_v59  ;;  %v258_v49 = vld [vmem:[#allocation6 + $0x128] sm:$0xff]  ;;  %v259_v56 = vld [vmem:[#allocation6 + $0x130] sm:$0xff]  ;;  %v260_v63 = vld [vmem:[#allocation6 + $0x138] sm:$0xff] }
  0x49   :  { %v860_v13 = vadd.f32 %v859_v6, %v736_v62  ;;  %v127_v6 = vld [vmem:[#allocation3 + $0xf8] sm:$0xff]  ;;  %v382_v57 = vld [vmem:[#allocation8 + $0x120] sm:$0xff] }
  0x4a   :  { %v502_v16 = vsub.f32 %v127_v6, %v252_v7  ;;  %v626_v24 = vmul.f32 %v501_v9, %v376_v15  ;;  %v750_v32 = vmul.f32 %v625_v17, %v500_v2  ;;  %v383_v0 = vld [vmem:[#allocation8 + $0x128] sm:$0xff]  ;;  %v261_v6 = vld [vmem:[#allocation6 + $0x140] sm:$0xff]  ;;  %v384_v7 = vld [vmem:[#allocation8 + $0x130] sm:$0xff] }
  0x4b   :  { %v861_v20 = vadd.f32 %v860_v13, %v737_v5  ;;  %v128_v13 = vld [vmem:[#allocation3 + $0x100] sm:$0xff] }
  0x4c   :  { %v503_v23 = vsub.f32 %v128_v13, %v253_v14  ;;  %v627_v31 = vmul.f32 %v502_v16, %v377_v22  ;;  %v751_v39 = vmul.f32 %v626_v24, %v501_v9  ;;  %v262_v13 = vld [vmem:[#allocation6 + $0x148] sm:$0xff]  ;;  %v385_v14 = vld [vmem:[#allocation8 + $0x138] sm:$0xff] }
  0x4d   :  { %v862_v27 = vadd.f32 %v861_v20, %v738_v12  ;;  %v129_v20 = vld [vmem:[#allocation3 + $0x108] sm:$0xff] }
  0x4e   :  { %v504_v30 = vsub.f32 %v129_v20, %v254_v21  ;;  %v628_v38 = vmul.f32 %v503_v23, %v378_v29  ;;  %v752_v46 = vmul.f32 %v627_v31, %v502_v16  ;;  %v263_v20 = vld [vmem:[#allocation6 + $0x150] sm:$0xff]  ;;  %v386_v21 = vld [vmem:[#allocation8 + $0x140] sm:$0xff] }
  0x4f   :  { %v863_v34 = vadd.f32 %v862_v27, %v739_v19  ;;  %v130_v27 = vld [vmem:[#allocation3 + $0x110] sm:$0xff] }
  0x50   :  { %v505_v37 = vsub.f32 %v130_v27, %v255_v28  ;;  %v629_v45 = vmul.f32 %v504_v30, %v379_v36  ;;  %v753_v53 = vmul.f32 %v628_v38, %v503_v23  ;;  %v264_v27 = vld [vmem:[#allocation6 + $0x158] sm:$0xff]  ;;  %v387_v28 = vld [vmem:[#allocation8 + $0x148] sm:$0xff] }
  0x51   :  { %v864_v41 = vadd.f32 %v863_v34, %v740_v26  ;;  %v131_v34 = vld [vmem:[#allocation3 + $0x118] sm:$0xff] }
  0x52   :  { %v506_v44 = vsub.f32 %v131_v34, %v256_v35  ;;  %v630_v52 = vmul.f32 %v505_v37, %v380_v43  ;;  %v754_v60 = vmul.f32 %v629_v45, %v504_v30  ;;  %v265_v34 = vld [vmem:[#allocation6 + $0x160] sm:$0xff]  ;;  %v388_v35 = vld [vmem:[#allocation8 + $0x150] sm:$0xff] }
  0x53   :  { %v865_v48 = vadd.f32 %v864_v41, %v741_v33  ;;  %v132_v41 = vld [vmem:[#allocation3 + $0x120] sm:$0xff] }
  0x54   :  { %v507_v51 = vsub.f32 %v132_v41, %v257_v42  ;;  %v631_v59 = vmul.f32 %v506_v44, %v381_v50  ;;  %v755_v3 = vmul.f32 %v630_v52, %v505_v37  ;;  %v266_v41 = vld [vmem:[#allocation6 + $0x168] sm:$0xff]  ;;  %v389_v42 = vld [vmem:[#allocation8 + $0x158] sm:$0xff] }
  0x55   :  { %v866_v55 = vadd.f32 %v865_v48, %v742_v40  ;;  %v133_v48 = vld [vmem:[#allocation3 + $0x128] sm:$0xff] }
  0x56   :  { %v508_v58 = vsub.f32 %v133_v48, %v258_v49  ;;  %v632_v2 = vmul.f32 %v507_v51, %v382_v57  ;;  %v756_v10 = vmul.f32 %v631_v59, %v506_v44  ;;  %v267_v48 = vld [vmem:[#allocation6 + $0x170] sm:$0xff]  ;;  %v390_v49 = vld [vmem:[#allocation8 + $0x160] sm:$0xff] }
  0x57   :  { %v867_v62 = vadd.f32 %v866_v55, %v743_v47  ;;  %v134_v55 = vld [vmem:[#allocation3 + $0x130] sm:$0xff] }
  0x58   :  { %v509_v1 = vsub.f32 %v134_v55, %v259_v56  ;;  %v633_v9 = vmul.f32 %v508_v58, %v383_v0  ;;  %v757_v17 = vmul.f32 %v632_v2, %v507_v51  ;;  %v268_v55 = vld [vmem:[#allocation6 + $0x178] sm:$0xff]  ;;  %v391_v56 = vld [vmem:[#allocation8 + $0x168] sm:$0xff] }
  0x59   :  { %v868_v5 = vadd.f32 %v867_v62, %v744_v54  ;;  %v135_v62 = vld [vmem:[#allocation3 + $0x138] sm:$0xff] }
  0x5a   :  { %v510_v8 = vsub.f32 %v135_v62, %v260_v63  ;;  %v634_v16 = vmul.f32 %v509_v1, %v384_v7  ;;  %v758_v24 = vmul.f32 %v633_v9, %v508_v58  ;;  %v269_v62 = vld [vmem:[#allocation6 + $0x180] sm:$0xff]  ;;  %v392_v63 = vld [vmem:[#allocation8 + $0x170] sm:$0xff] }
  0x5b   :  { %v869_v12 = vadd.f32 %v868_v5, %v745_v61  ;;  %v136_v5 = vld [vmem:[#allocation3 + $0x140] sm:$0xff] }
  0x5c   :  { %v511_v15 = vsub.f32 %v136_v5, %v261_v6  ;;  %v635_v23 = vmul.f32 %v510_v8, %v385_v14  ;;  %v759_v31 = vmul.f32 %v634_v16, %v509_v1  ;;  %v270_v5 = vld [vmem:[#allocation6 + $0x188] sm:$0xff]  ;;  %v393_v6 = vld [vmem:[#allocation8 + $0x178] sm:$0xff] }
  0x5d   :  { %v870_v19 = vadd.f32 %v869_v12, %v746_v4  ;;  %v137_v12 = vld [vmem:[#allocation3 + $0x148] sm:$0xff] }
  0x5e   :  { %v512_v22 = vsub.f32 %v137_v12, %v262_v13  ;;  %v636_v30 = vmul.f32 %v511_v15, %v386_v21  ;;  %v760_v38 = vmul.f32 %v635_v23, %v510_v8  ;;  %v271_v12 = vld [vmem:[#allocation6 + $0x190] sm:$0xff]  ;;  %v394_v13 = vld [vmem:[#allocation8 + $0x180] sm:$0xff] }
  0x5f   :  { %v871_v26 = vadd.f32 %v870_v19, %v747_v11  ;;  %v138_v19 = vld [vmem:[#allocation3 + $0x150] sm:$0xff] }
  0x60   :  { %v513_v29 = vsub.f32 %v138_v19, %v263_v20  ;;  %v637_v37 = vmul.f32 %v512_v22, %v387_v28  ;;  %v761_v45 = vmul.f32 %v636_v30, %v511_v15  ;;  %v272_v19 = vld [vmem:[#allocation6 + $0x198] sm:$0xff]  ;;  %v395_v20 = vld [vmem:[#allocation8 + $0x188] sm:$0xff] }
  0x61   :  { %v872_v33 = vadd.f32 %v871_v26, %v748_v18  ;;  %v139_v26 = vld [vmem:[#allocation3 + $0x158] sm:$0xff] }
  0x62   :  { %v514_v36 = vsub.f32 %v139_v26, %v264_v27  ;;  %v638_v44 = vmul.f32 %v513_v29, %v388_v35  ;;  %v762_v52 = vmul.f32 %v637_v37, %v512_v22  ;;  %v273_v26 = vld [vmem:[#allocation6 + $0x1a0] sm:$0xff]  ;;  %v396_v27 = vld [vmem:[#allocation8 + $0x190] sm:$0xff] }
  0x63   :  { %v873_v40 = vadd.f32 %v872_v33, %v749_v25  ;;  %v140_v33 = vld [vmem:[#allocation3 + $0x160] sm:$0xff] }
  0x64   :  { %v515_v43 = vsub.f32 %v140_v33, %v265_v34  ;;  %v639_v51 = vmul.f32 %v514_v36, %v389_v42  ;;  %v763_v59 = vmul.f32 %v638_v44, %v513_v29  ;;  %v274_v33 = vld [vmem:[#allocation6 + $0x1a8] sm:$0xff]  ;;  %v397_v34 = vld [vmem:[#allocation8 + $0x198] sm:$0xff] }
  0x65   :  { %v874_v47 = vadd.f32 %v873_v40, %v750_v32  ;;  %v141_v40 = vld [vmem:[#allocation3 + $0x168] sm:$0xff] }
  0x66   :  { %v516_v50 = vsub.f32 %v141_v40, %v266_v41  ;;  %v640_v58 = vmul.f32 %v515_v43, %v390_v49  ;;  %v764_v2 = vmul.f32 %v639_v51, %v514_v36  ;;  %v275_v40 = vld [vmem:[#allocation6 + $0x1b0] sm:$0xff]  ;;  %v398_v41 = vld [vmem:[#allocation8 + $0x1a0] sm:$0xff] }
  0x67   :  { %v875_v54 = vadd.f32 %v874_v47, %v751_v39  ;;  %v142_v47 = vld [vmem:[#allocation3 + $0x170] sm:$0xff] }
  0x68   :  { %v517_v57 = vsub.f32 %v142_v47, %v267_v48  ;;  %v641_v1 = vmul.f32 %v516_v50, %v391_v56  ;;  %v765_v9 = vmul.f32 %v640_v58, %v515_v43  ;;  %v276_v47 = vld [vmem:[#allocation6 + $0x1b8] sm:$0xff]  ;;  %v399_v48 = vld [vmem:[#allocation8 + $0x1a8] sm:$0xff] }
  0x69   :  { %v876_v61 = vadd.f32 %v875_v54, %v752_v46  ;;  %v143_v54 = vld [vmem:[#allocation3 + $0x178] sm:$0xff] }
  0x6a   :  { %v518_v0 = vsub.f32 %v143_v54, %v268_v55  ;;  %v642_v8 = vmul.f32 %v517_v57, %v392_v63  ;;  %v766_v16 = vmul.f32 %v641_v1, %v516_v50  ;;  %v277_v54 = vld [vmem:[#allocation6 + $0x1c0] sm:$0xff]  ;;  %v400_v55 = vld [vmem:[#allocation8 + $0x1b0] sm:$0xff] }
  0x6b   :  { %v877_v4 = vadd.f32 %v876_v61, %v753_v53  ;;  %v144_v61 = vld [vmem:[#allocation3 + $0x180] sm:$0xff] }
  0x6c   :  { %v519_v7 = vsub.f32 %v144_v61, %v269_v62  ;;  %v643_v15 = vmul.f32 %v518_v0, %v393_v6  ;;  %v767_v23 = vmul.f32 %v642_v8, %v517_v57  ;;  %v278_v61 = vld [vmem:[#allocation6 + $0x1c8] sm:$0xff]  ;;  %v401_v62 = vld [vmem:[#allocation8 + $0x1b8] sm:$0xff] }
  0x6d   :  { %v878_v11 = vadd.f32 %v877_v4, %v754_v60  ;;  %v145_v4 = vld [vmem:[#allocation3 + $0x188] sm:$0xff] }
  0x6e   :  { %v520_v14 = vsub.f32 %v145_v4, %v270_v5  ;;  %v644_v22 = vmul.f32 %v519_v7, %v394_v13  ;;  %v768_v30 = vmul.f32 %v643_v15, %v518_v0  ;;  %v279_v4 = vld [vmem:[#allocation6 + $0x1d0] sm:$0xff]  ;;  %v402_v5 = vld [vmem:[#allocation8 + $0x1c0] sm:$0xff] }
  0x6f   :  { %v879_v18 = vadd.f32 %v878_v11, %v755_v3  ;;  %v146_v11 = vld [vmem:[#allocation3 + $0x190] sm:$0xff] }
  0x70   :  { %v521_v21 = vsub.f32 %v146_v11, %v271_v12  ;;  %v645_v29 = vmul.f32 %v520_v14, %v395_v20  ;;  %v769_v37 = vmul.f32 %v644_v22, %v519_v7  ;;  %v280_v11 = vld [vmem:[#allocation6 + $0x1d8] sm:$0xff]  ;;  %v403_v12 = vld [vmem:[#allocation8 + $0x1c8] sm:$0xff] }
  0x71   :  { %v880_v25 = vadd.f32 %v879_v18, %v756_v10  ;;  %v147_v18 = vld [vmem:[#allocation3 + $0x198] sm:$0xff] }
  0x72   :  { %v522_v28 = vsub.f32 %v147_v18, %v272_v19  ;;  %v646_v36 = vmul.f32 %v521_v21, %v396_v27  ;;  %v770_v44 = vmul.f32 %v645_v29, %v520_v14  ;;  %v281_v18 = vld [vmem:[#allocation6 + $0x1e0] sm:$0xff]  ;;  %v404_v19 = vld [vmem:[#allocation8 + $0x1d0] sm:$0xff] }
  0x73   :  { %v881_v32 = vadd.f32 %v880_v25, %v757_v17  ;;  %v148_v25 = vld [vmem:[#allocation3 + $0x1a0] sm:$0xff] }
  0x74   :  { %v523_v35 = vsub.f32 %v148_v25, %v273_v26  ;;  %v647_v43 = vmul.f32 %v522_v28, %v397_v34  ;;  %v771_v51 = vmul.f32 %v646_v36, %v521_v21  ;;  %v282_v25 = vld [vmem:[#allocation6 + $0x1e8] sm:$0xff]  ;;  %v405_v26 = vld [vmem:[#allocation8 + $0x1d8] sm:$0xff] }
  0x75   :  { %v882_v39 = vadd.f32 %v881_v32, %v758_v24  ;;  %v149_v32 = vld [vmem:[#allocation3 + $0x1a8] sm:$0xff] }
  0x76   :  { %v524_v42 = vsub.f32 %v149_v32, %v274_v33  ;;  %v648_v50 = vmul.f32 %v523_v35, %v398_v41  ;;  %v772_v58 = vmul.f32 %v647_v43, %v522_v28  ;;  %v283_v32 = vld [vmem:[#allocation6 + $0x1f0] sm:$0xff]  ;;  %v406_v33 = vld [vmem:[#allocation8 + $0x1e0] sm:$0xff] }
  0x77   :  { %v883_v46 = vadd.f32 %v882_v39, %v759_v31  ;;  %v150_v39 = vld [vmem:[#allocation3 + $0x1b0] sm:$0xff] }
  0x78   :  { %v525_v49 = vsub.f32 %v150_v39, %v275_v40  ;;  %v649_v57 = vmul.f32 %v524_v42, %v399_v48  ;;  %v773_v1 = vmul.f32 %v648_v50, %v523_v35  ;;  %v284_v39 = vld [vmem:[#allocation6 + $0x1f8] sm:$0xff]  ;;  %v407_v40 = vld [vmem:[#allocation8 + $0x1e8] sm:$0xff] }
  0x79   :  { %v884_v53 = vadd.f32 %v883_v46, %v760_v38  ;;  %v151_v46 = vld [vmem:[#allocation3 + $0x1b8] sm:$0xff] }
  0x7a   :  { %v526_v56 = vsub.f32 %v151_v46, %v276_v47  ;;  %v650_v0 = vmul.f32 %v525_v49, %v400_v55  ;;  %v774_v8 = vmul.f32 %v649_v57, %v524_v42  ;;  %v285_v46 = vld [vmem:[#allocation6 + $0x200] sm:$0xff]  ;;  %v408_v47 = vld [vmem:[#allocation8 + $0x1f0] sm:$0xff] }
  0x7b   :  { %v885_v60 = vadd.f32 %v884_v53, %v761_v45  ;;  %v152_v53 = vld [vmem:[#allocation3 + $0x1c0] sm:$0xff] }
  0x7c   :  { %v527_v63 = vsub.f32 %v152_v53, %v277_v54  ;;  %v651_v7 = vmul.f32 %v526_v56, %v401_v62  ;;  %v775_v15 = vmul.f32 %v650_v0, %v525_v49  ;;  %v286_v53 = vld [vmem:[#allocation6 + $0x208] sm:$0xff]  ;;  %v409_v54 = vld [vmem:[#allocation8 + $0x1f8] sm:$0xff] }
  0x7d   :  { %v886_v3 = vadd.f32 %v885_v60, %v762_v52  ;;  %v153_v60 = vld [vmem:[#allocation3 + $0x1c8] sm:$0xff] }
  0x7e   :  { %v528_v6 = vsub.f32 %v153_v60, %v278_v61  ;;  %v652_v14 = vmul.f32 %v527_v63, %v402_v5  ;;  %v776_v22 = vmul.f32 %v651_v7, %v526_v56  ;;  %v287_v60 = vld [vmem:[#allocation6 + $0x210] sm:$0xff]  ;;  %v410_v61 = vld [vmem:[#allocation8 + $0x200] sm:$0xff] }
  0x7f   :  { %v887_v10 = vadd.f32 %v886_v3, %v763_v59  ;;  %v154_v3 = vld [vmem:[#allocation3 + $0x1d0] sm:$0xff] }
  0x80   :  { %v529_v13 = vsub.f32 %v154_v3, %v279_v4  ;;  %v653_v21 = vmul.f32 %v528_v6, %v403_v12  ;;  %v777_v29 = vmul.f32 %v652_v14, %v527_v63  ;;  %v288_v3 = vld [vmem:[#allocation6 + $0x218] sm:$0xff]  ;;  %v411_v4 = vld [vmem:[#allocation8 + $0x208] sm:$0xff] }
  0x81   :  { %v888_v17 = vadd.f32 %v887_v10, %v764_v2  ;;  %v155_v10 = vld [vmem:[#allocation3 + $0x1d8] sm:$0xff] }
  0x82   :  { %v530_v20 = vsub.f32 %v155_v10, %v280_v11  ;;  %v654_v28 = vmul.f32 %v529_v13, %v404_v19  ;;  %v778_v36 = vmul.f32 %v653_v21, %v528_v6  ;;  %v289_v10 = vld [vmem:[#allocation6 + $0x220] sm:$0xff]  ;;  %v412_v11 = vld [vmem:[#allocation8 + $0x210] sm:$0xff] }
  0x83   :  { %v889_v24 = vadd.f32 %v888_v17, %v765_v9  ;;  %v156_v17 = vld [vmem:[#allocation3 + $0x1e0] sm:$0xff] }
  0x84   :  { %v531_v27 = vsub.f32 %v156_v17, %v281_v18  ;;  %v655_v35 = vmul.f32 %v530_v20, %v405_v26  ;;  %v779_v43 = vmul.f32 %v654_v28, %v529_v13  ;;  %v290_v17 = vld [vmem:[#allocation6 + $0x228] sm:$0xff]  ;;  %v413_v18 = vld [vmem:[#allocation8 + $0x218] sm:$0xff] }
  0x85   :  { %v890_v31 = vadd.f32 %v889_v24, %v766_v16  ;;  %v157_v24 = vld [vmem:[#allocation3 + $0x1e8] sm:$0xff] }
  0x86   :  { %v532_v34 = vsub.f32 %v157_v24, %v282_v25  ;;  %v656_v42 = vmul.f32 %v531_v27, %v406_v33  ;;  %v780_v50 = vmul.f32 %v655_v35, %v530_v20  ;;  %v291_v24 = vld [vmem:[#allocation6 + $0x230] sm:$0xff]  ;;  %v414_v25 = vld [vmem:[#allocation8 + $0x220] sm:$0xff] }
  0x87   :  { %v891_v38 = vadd.f32 %v890_v31, %v767_v23  ;;  %v158_v31 = vld [vmem:[#allocation3 + $0x1f0] sm:$0xff] }
  0x88   :  { %v533_v41 = vsub.f32 %v158_v31, %v283_v32  ;;  %v657_v49 = vmul.f32 %v532_v34, %v407_v40  ;;  %v781_v57 = vmul.f32 %v656_v42, %v531_v27  ;;  %v292_v31 = vld [vmem:[#allocation6 + $0x238] sm:$0xff]  ;;  %v415_v32 = vld [vmem:[#allocation8 + $0x228] sm:$0xff] }
  0x89   :  { %v892_v45 = vadd.f32 %v891_v38, %v768_v30  ;;  %v159_v38 = vld [vmem:[#allocation3 + $0x1f8] sm:$0xff] }
  0x8a   :  { %v534_v48 = vsub.f32 %v159_v38, %v284_v39  ;;  %v658_v56 = vmul.f32 %v533_v41, %v408_v47  ;;  %v782_v0 = vmul.f32 %v657_v49, %v532_v34  ;;  %v293_v38 = vld [vmem:[#allocation6 + $0x240] sm:$0xff]  ;;  %v416_v39 = vld [vmem:[#allocation8 + $0x230] sm:$0xff] }
  0x8b   :  { %v893_v52 = vadd.f32 %v892_v45, %v769_v37  ;;  %v160_v45 = vld [vmem:[#allocation3 + $0x200] sm:$0xff] }
  0x8c   :  { %v535_v55 = vsub.f32 %v160_v45, %v285_v46  ;;  %v659_v63 = vmul.f32 %v534_v48, %v409_v54  ;;  %v783_v7 = vmul.f32 %v658_v56, %v533_v41  ;;  %v294_v45 = vld [vmem:[#allocation6 + $0x248] sm:$0xff]  ;;  %v417_v46 = vld [vmem:[#allocation8 + $0x238] sm:$0xff] }
  0x8d   :  { %v894_v59 = vadd.f32 %v893_v52, %v770_v44  ;;  %v161_v52 = vld [vmem:[#allocation3 + $0x208] sm:$0xff] }
  0x8e   :  { %v536_v62 = vsub.f32 %v161_v52, %v286_v53  ;;  %v660_v6 = vmul.f32 %v535_v55, %v410_v61  ;;  %v784_v14 = vmul.f32 %v659_v63, %v534_v48  ;;  %v295_v52 = vld [vmem:[#allocation6 + $0x250] sm:$0xff]  ;;  %v418_v53 = vld [vmem:[#allocation8 + $0x240] sm:$0xff] }
  0x8f   :  { %v895_v2 = vadd.f32 %v894_v59, %v771_v51  ;;  %v162_v59 = vld [vmem:[#allocation3 + $0x210] sm:$0xff] }
  0x90   :  { %v537_v5 = vsub.f32 %v162_v59, %v287_v60  ;;  %v661_v13 = vmul.f32 %v536_v62, %v411_v4  ;;  %v785_v21 = vmul.f32 %v660_v6, %v535_v55  ;;  %v296_v59 = vld [vmem:[#allocation6 + $0x258] sm:$0xff]  ;;  %v419_v60 = vld [vmem:[#allocation8 + $0x248] sm:$0xff] }
  0x91   :  { %v896_v9 = vadd.f32 %v895_v2, %v772_v58  ;;  %v163_v2 = vld [vmem:[#allocation3 + $0x218] sm:$0xff] }
  0x92   :  { %v538_v12 = vsub.f32 %v163_v2, %v288_v3  ;;  %v662_v20 = vmul.f32 %v537_v5, %v412_v11  ;;  %v786_v28 = vmul.f32 %v661_v13, %v536_v62  ;;  %v297_v2 = vld [vmem:[#allocation6 + $0x260] sm:$0xff]  ;;  %v420_v3 = vld [vmem:[#allocation8 + $0x250] sm:$0xff] }
  0x93   :  { %v897_v16 = vadd.f32 %v896_v9, %v773_v1  ;;  %v164_v9 = vld [vmem:[#allocation3 + $0x220] sm:$0xff] }
  0x94   :  { %v539_v19 = vsub.f32 %v164_v9, %v289_v10  ;;  %v663_v27 = vmul.f32 %v538_v12, %v413_v18  ;;  %v787_v35 = vmul.f32 %v662_v20, %v537_v5  ;;  %v298_v9 = vld [vmem:[#allocation6 + $0x268] sm:$0xff]  ;;  %v421_v10 = vld [vmem:[#allocation8 + $0x258] sm:$0xff] }
  0x95   :  { %v898_v23 = vadd.f32 %v897_v16, %v774_v8  ;;  %v165_v16 = vld [vmem:[#allocation3 + $0x228] sm:$0xff] }
  0x96   :  { %v540_v26 = vsub.f32 %v165_v16, %v290_v17  ;;  %v664_v34 = vmul.f32 %v539_v19, %v414_v25  ;;  %v788_v42 = vmul.f32 %v663_v27, %v538_v12  ;;  %v299_v16 = vld [vmem:[#allocation6 + $0x270] sm:$0xff]  ;;  %v422_v17 = vld [vmem:[#allocation8 + $0x260] sm:$0xff] }
  0x97   :  { %v899_v30 = vadd.f32 %v898_v23, %v775_v15  ;;  %v166_v23 = vld [vmem:[#allocation3 + $0x230] sm:$0xff] }
  0x98   :  { %v541_v33 = vsub.f32 %v166_v23, %v291_v24  ;;  %v665_v41 = vmul.f32 %v540_v26, %v415_v32  ;;  %v789_v49 = vmul.f32 %v664_v34, %v539_v19  ;;  %v300_v23 = vld [vmem:[#allocation6 + $0x278] sm:$0xff]  ;;  %v423_v24 = vld [vmem:[#allocation8 + $0x268] sm:$0xff] }
  0x99   :  { %v900_v37 = vadd.f32 %v899_v30, %v776_v22  ;;  %v167_v30 = vld [vmem:[#allocation3 + $0x238] sm:$0xff] }
  0x9a   :  { %v542_v40 = vsub.f32 %v167_v30, %v292_v31  ;;  %v666_v48 = vmul.f32 %v541_v33, %v416_v39  ;;  %v790_v56 = vmul.f32 %v665_v41, %v540_v26  ;;  %v301_v30 = vld [vmem:[#allocation6 + $0x280] sm:$0xff]  ;;  %v424_v31 = vld [vmem:[#allocation8 + $0x270] sm:$0xff] }
  0x9b   :  { %v901_v44 = vadd.f32 %v900_v37, %v777_v29  ;;  %v168_v37 = vld [vmem:[#allocation3 + $0x240] sm:$0xff] }
  0x9c   :  { %v543_v47 = vsub.f32 %v168_v37, %v293_v38  ;;  %v667_v55 = vmul.f32 %v542_v40, %v417_v46  ;;  %v791_v63 = vmul.f32 %v666_v48, %v541_v33  ;;  %v302_v37 = vld [vmem:[#allocation6 + $0x288] sm:$0xff]  ;;  %v425_v38 = vld [vmem:[#allocation8 + $0x278] sm:$0xff] }
  0x9d   :  { %v902_v51 = vadd.f32 %v901_v44, %v778_v36  ;;  %v169_v44 = vld [vmem:[#allocation3 + $0x248] sm:$0xff] }
  0x9e   :  { %v544_v54 = vsub.f32 %v169_v44, %v294_v45  ;;  %v668_v62 = vmul.f32 %v543_v47, %v418_v53  ;;  %v792_v6 = vmul.f32 %v667_v55, %v542_v40  ;;  %v303_v44 = vld [vmem:[#allocation6 + $0x290] sm:$0xff]  ;;  %v426_v45 = vld [vmem:[#allocation8 + $0x280] sm:$0xff] }
  0x9f   :  { %v903_v58 = vadd.f32 %v902_v51, %v779_v43  ;;  %v170_v51 = vld [vmem:[#allocation3 + $0x250] sm:$0xff] }
  0xa0   :  { %v545_v61 = vsub.f32 %v170_v51, %v295_v52  ;;  %v669_v5 = vmul.f32 %v544_v54, %v419_v60  ;;  %v793_v13 = vmul.f32 %v668_v62, %v543_v47  ;;  %v304_v51 = vld [vmem:[#allocation6 + $0x298] sm:$0xff]  ;;  %v427_v52 = vld [vmem:[#allocation8 + $0x288] sm:$0xff] }
  0xa1   :  { %v904_v1 = vadd.f32 %v903_v58, %v780_v50  ;;  %v171_v58 = vld [vmem:[#allocation3 + $0x258] sm:$0xff] }
  0xa2   :  { %v546_v4 = vsub.f32 %v171_v58, %v296_v59  ;;  %v670_v12 = vmul.f32 %v545_v61, %v420_v3  ;;  %v794_v20 = vmul.f32 %v669_v5, %v544_v54  ;;  %v305_v58 = vld [vmem:[#allocation6 + $0x2a0] sm:$0xff]  ;;  %v428_v59 = vld [vmem:[#allocation8 + $0x290] sm:$0xff] }
  0xa3   :  { %v905_v8 = vadd.f32 %v904_v1, %v781_v57  ;;  %v172_v1 = vld [vmem:[#allocation3 + $0x260] sm:$0xff] }
  0xa4   :  { %v547_v11 = vsub.f32 %v172_v1, %v297_v2  ;;  %v671_v19 = vmul.f32 %v546_v4, %v421_v10  ;;  %v795_v27 = vmul.f32 %v670_v12, %v545_v61  ;;  %v306_v1 = vld [vmem:[#allocation6 + $0x2a8] sm:$0xff]  ;;  %v429_v2 = vld [vmem:[#allocation8 + $0x298] sm:$0xff] }
  0xa5   :  { %v906_v15 = vadd.f32 %v905_v8, %v782_v0  ;;  %v173_v8 = vld [vmem:[#allocation3 + $0x268] sm:$0xff] }
  0xa6   :  { %v548_v18 = vsub.f32 %v173_v8, %v298_v9  ;;  %v672_v26 = vmul.f32 %v547_v11, %v422_v17  ;;  %v796_v34 = vmul.f32 %v671_v19, %v546_v4  ;;  %v307_v8 = vld [vmem:[#allocation6 + $0x2b0] sm:$0xff]  ;;  %v430_v9 = vld [vmem:[#allocation8 + $0x2a0] sm:$0xff] }
  0xa7   :  { %v907_v22 = vadd.f32 %v906_v15, %v783_v7  ;;  %v174_v15 = vld [vmem:[#allocation3 + $0x270] sm:$0xff] }
  0xa8   :  { %v549_v25 = vsub.f32 %v174_v15, %v299_v16  ;;  %v673_v33 = vmul.f32 %v548_v18, %v423_v24  ;;  %v797_v41 = vmul.f32 %v672_v26, %v547_v11  ;;  %v308_v15 = vld [vmem:[#allocation6 + $0x2b8] sm:$0xff]  ;;  %v431_v16 = vld [vmem:[#allocation8 + $0x2a8] sm:$0xff] }
  0xa9   :  { %v908_v29 = vadd.f32 %v907_v22, %v784_v14  ;;  %v175_v22 = vld [vmem:[#allocation3 + $0x278] sm:$0xff] }
  0xaa   :  { %v550_v32 = vsub.f32 %v175_v22, %v300_v23  ;;  %v674_v40 = vmul.f32 %v549_v25, %v424_v31  ;;  %v798_v48 = vmul.f32 %v673_v33, %v548_v18  ;;  %v309_v22 = vld [vmem:[#allocation6 + $0x2c0] sm:$0xff]  ;;  %v432_v23 = vld [vmem:[#allocation8 + $0x2b0] sm:$0xff] }
  0xab   :  { %v909_v36 = vadd.f32 %v908_v29, %v785_v21  ;;  %v176_v29 = vld [vmem:[#allocation3 + $0x280] sm:$0xff] }
  0xac   :  { %v551_v39 = vsub.f32 %v176_v29, %v301_v30  ;;  %v675_v47 = vmul.f32 %v550_v32, %v425_v38  ;;  %v799_v55 = vmul.f32 %v674_v40, %v549_v25  ;;  %v310_v29 = vld [vmem:[#allocation6 + $0x2c8] sm:$0xff]  ;;  %v433_v30 = vld [vmem:[#allocation8 + $0x2b8] sm:$0xff] }
  0xad   :  { %v910_v43 = vadd.f32 %v909_v36, %v786_v28  ;;  %v177_v36 = vld [vmem:[#allocation3 + $0x288] sm:$0xff] }
  0xae   :  { %v552_v46 = vsub.f32 %v177_v36, %v302_v37  ;;  %v676_v54 = vmul.f32 %v551_v39, %v426_v45  ;;  %v800_v62 = vmul.f32 %v675_v47, %v550_v32  ;;  %v311_v36 = vld [vmem:[#allocation6 + $0x2d0] sm:$0xff]  ;;  %v434_v37 = vld [vmem:[#allocation8 + $0x2c0] sm:$0xff] }
  0xaf   :  { %v911_v50 = vadd.f32 %v910_v43, %v787_v35  ;;  %v178_v43 = vld [vmem:[#allocation3 + $0x290] sm:$0xff] }
  0xb0   :  { %v553_v53 = vsub.f32 %v178_v43, %v303_v44  ;;  %v677_v61 = vmul.f32 %v552_v46, %v427_v52  ;;  %v801_v5 = vmul.f32 %v676_v54, %v551_v39  ;;  %v312_v43 = vld [vmem:[#allocation6 + $0x2d8] sm:$0xff]  ;;  %v435_v44 = vld [vmem:[#allocation8 + $0x2c8] sm:$0xff] }
  0xb1   :  { %v912_v57 = vadd.f32 %v911_v50, %v788_v42  ;;  %v179_v50 = vld [vmem:[#allocation3 + $0x298] sm:$0xff] }
  0xb2   :  { %v554_v60 = vsub.f32 %v179_v50, %v304_v51  ;;  %v678_v4 = vmul.f32 %v553_v53, %v428_v59  ;;  %v802_v12 = vmul.f32 %v677_v61, %v552_v46  ;;  %v313_v50 = vld [vmem:[#allocation6 + $0x2e0] sm:$0xff]  ;;  %v436_v51 = vld [vmem:[#allocation8 + $0x2d0] sm:$0xff] }
  0xb3   :  { %v913_v0 = vadd.f32 %v912_v57, %v789_v49  ;;  %v180_v57 = vld [vmem:[#allocation3 + $0x2a0] sm:$0xff] }
  0xb4   :  { %v555_v3 = vsub.f32 %v180_v57, %v305_v58  ;;  %v679_v11 = vmul.f32 %v554_v60, %v429_v2  ;;  %v803_v19 = vmul.f32 %v678_v4, %v553_v53  ;;  %v314_v57 = vld [vmem:[#allocation6 + $0x2e8] sm:$0xff]  ;;  %v437_v58 = vld [vmem:[#allocation8 + $0x2d8] sm:$0xff] }
  0xb5   :  { %v914_v7 = vadd.f32 %v913_v0, %v790_v56  ;;  %v181_v0 = vld [vmem:[#allocation3 + $0x2a8] sm:$0xff] }
  0xb6   :  { %v556_v10 = vsub.f32 %v181_v0, %v306_v1  ;;  %v680_v18 = vmul.f32 %v555_v3, %v430_v9  ;;  %v804_v26 = vmul.f32 %v679_v11, %v554_v60  ;;  %v315_v0 = vld [vmem:[#allocation6 + $0x2f0] sm:$0xff]  ;;  %v438_v1 = vld [vmem:[#allocation8 + $0x2e0] sm:$0xff] }
  0xb7   :  { %v915_v14 = vadd.f32 %v914_v7, %v791_v63  ;;  %v182_v7 = vld [vmem:[#allocation3 + $0x2b0] sm:$0xff] }
  0xb8   :  { %v557_v17 = vsub.f32 %v182_v7, %v307_v8  ;;  %v681_v25 = vmul.f32 %v556_v10, %v431_v16  ;;  %v805_v33 = vmul.f32 %v680_v18, %v555_v3  ;;  %v316_v7 = vld [vmem:[#allocation6 + $0x2f8] sm:$0xff]  ;;  %v439_v8 = vld [vmem:[#allocation8 + $0x2e8] sm:$0xff] }
  0xb9   :  { %v916_v21 = vadd.f32 %v915_v14, %v792_v6  ;;  %v183_v14 = vld [vmem:[#allocation3 + $0x2b8] sm:$0xff] }
  0xba   :  { %v558_v24 = vsub.f32 %v183_v14, %v308_v15  ;;  %v682_v32 = vmul.f32 %v557_v17, %v432_v23  ;;  %v806_v40 = vmul.f32 %v681_v25, %v556_v10  ;;  %v317_v14 = vld [vmem:[#allocation6 + $0x300] sm:$0xff]  ;;  %v440_v15 = vld [vmem:[#allocation8 + $0x2f0] sm:$0xff] }
  0xbb   :  { %v917_v28 = vadd.f32 %v916_v21, %v793_v13  ;;  %v184_v21 = vld [vmem:[#allocation3 + $0x2c0] sm:$0xff] }
  0xbc   :  { %v559_v31 = vsub.f32 %v184_v21, %v309_v22  ;;  %v683_v39 = vmul.f32 %v558_v24, %v433_v30  ;;  %v807_v47 = vmul.f32 %v682_v32, %v557_v17  ;;  %v318_v21 = vld [vmem:[#allocation6 + $0x308] sm:$0xff]  ;;  %v441_v22 = vld [vmem:[#allocation8 + $0x2f8] sm:$0xff] }
  0xbd   :  { %v918_v35 = vadd.f32 %v917_v28, %v794_v20  ;;  %v185_v28 = vld [vmem:[#allocation3 + $0x2c8] sm:$0xff] }
  0xbe   :  { %v560_v38 = vsub.f32 %v185_v28, %v310_v29  ;;  %v684_v46 = vmul.f32 %v559_v31, %v434_v37  ;;  %v808_v54 = vmul.f32 %v683_v39, %v558_v24  ;;  %v319_v28 = vld [vmem:[#allocation6 + $0x310] sm:$0xff]  ;;  %v442_v29 = vld [vmem:[#allocation8 + $0x300] sm:$0xff] }
  0xbf   :  { %v919_v42 = vadd.f32 %v918_v35, %v795_v27  ;;  %v186_v35 = vld [vmem:[#allocation3 + $0x2d0] sm:$0xff] }
  0xc0   :  { %v561_v45 = vsub.f32 %v186_v35, %v311_v36  ;;  %v685_v53 = vmul.f32 %v560_v38, %v435_v44  ;;  %v809_v61 = vmul.f32 %v684_v46, %v559_v31  ;;  %v320_v35 = vld [vmem:[#allocation6 + $0x318] sm:$0xff]  ;;  %v443_v36 = vld [vmem:[#allocation8 + $0x308] sm:$0xff] }
  0xc1   :  { %v920_v49 = vadd.f32 %v919_v42, %v796_v34  ;;  %v187_v42 = vld [vmem:[#allocation3 + $0x2d8] sm:$0xff] }
  0xc2   :  { %v562_v52 = vsub.f32 %v187_v42, %v312_v43  ;;  %v686_v60 = vmul.f32 %v561_v45, %v436_v51  ;;  %v810_v4 = vmul.f32 %v685_v53, %v560_v38  ;;  %v321_v42 = vld [vmem:[#allocation6 + $0x320] sm:$0xff]  ;;  %v444_v43 = vld [vmem:[#allocation8 + $0x310] sm:$0xff] }
  0xc3   :  { %v921_v56 = vadd.f32 %v920_v49, %v797_v41  ;;  %v188_v49 = vld [vmem:[#allocation3 + $0x2e0] sm:$0xff] }
  0xc4   :  { %v563_v59 = vsub.f32 %v188_v49, %v313_v50  ;;  %v687_v3 = vmul.f32 %v562_v52, %v437_v58  ;;  %v811_v11 = vmul.f32 %v686_v60, %v561_v45  ;;  %v322_v49 = vld [vmem:[#allocation6 + $0x328] sm:$0xff]  ;;  %v445_v50 = vld [vmem:[#allocation8 + $0x318] sm:$0xff] }
  0xc5   :  { %v922_v63 = vadd.f32 %v921_v56, %v798_v48  ;;  %v189_v56 = vld [vmem:[#allocation3 + $0x2e8] sm:$0xff] }
  0xc6   :  { %v564_v2 = vsub.f32 %v189_v56, %v314_v57  ;;  %v688_v10 = vmul.f32 %v563_v59, %v438_v1  ;;  %v812_v18 = vmul.f32 %v687_v3, %v562_v52  ;;  %v323_v56 = vld [vmem:[#allocation6 + $0x330] sm:$0xff]  ;;  %v446_v57 = vld [vmem:[#allocation8 + $0x320] sm:$0xff] }
  0xc7   :  { %v923_v6 = vadd.f32 %v922_v63, %v799_v55  ;;  %v190_v63 = vld [vmem:[#allocation3 + $0x2f0] sm:$0xff] }
  0xc8   :  { %v565_v9 = vsub.f32 %v190_v63, %v315_v0  ;;  %v689_v17 = vmul.f32 %v564_v2, %v439_v8  ;;  %v813_v25 = vmul.f32 %v688_v10, %v563_v59  ;;  %v324_v63 = vld [vmem:[#allocation6 + $0x338] sm:$0xff]  ;;  %v447_v0 = vld [vmem:[#allocation8 + $0x328] sm:$0xff] }
  0xc9   :  { %v924_v13 = vadd.f32 %v923_v6, %v800_v62  ;;  %v191_v6 = vld [vmem:[#allocation3 + $0x2f8] sm:$0xff] }
  0xca   :  { %v566_v16 = vsub.f32 %v191_v6, %v316_v7  ;;  %v690_v24 = vmul.f32 %v565_v9, %v440_v15  ;;  %v814_v32 = vmul.f32 %v689_v17, %v564_v2  ;;  %v325_v6 = vld [vmem:[#allocation6 + $0x340] sm:$0xff]  ;;  %v448_v7 = vld [vmem:[#allocation8 + $0x330] sm:$0xff] }
  0xcb   :  { %v925_v20 = vadd.f32 %v924_v13, %v801_v5  ;;  %v192_v13 = vld [vmem:[#allocation3 + $0x300] sm:$0xff] }
  0xcc   :  { %v567_v23 = vsub.f32 %v192_v13, %v317_v14  ;;  %v691_v31 = vmul.f32 %v566_v16, %v441_v22  ;;  %v815_v39 = vmul.f32 %v690_v24, %v565_v9  ;;  %v326_v13 = vld [vmem:[#allocation6 + $0x348] sm:$0xff]  ;;  %v449_v14 = vld [vmem:[#allocation8 + $0x338] sm:$0xff] }
  0xcd   :  { %v926_v27 = vadd.f32 %v925_v20, %v802_v12  ;;  %v193_v20 = vld [vmem:[#allocation3 + $0x308] sm:$0xff] }
  0xce   :  { %v568_v30 = vsub.f32 %v193_v20, %v318_v21  ;;  %v692_v38 = vmul.f32 %v567_v23, %v442_v29  ;;  %v816_v46 = vmul.f32 %v691_v31, %v566_v16  ;;  %v327_v20 = vld [vmem:[#allocation6 + $0x350] sm:$0xff]  ;;  %v450_v21 = vld [vmem:[#allocation8 + $0x340] sm:$0xff] }
  0xcf   :  { %v927_v34 = vadd.f32 %v926_v27, %v803_v19  ;;  %v194_v27 = vld [vmem:[#allocation3 + $0x310] sm:$0xff] }
  0xd0   :  { %v569_v37 = vsub.f32 %v194_v27, %v319_v28  ;;  %v693_v45 = vmul.f32 %v568_v30, %v443_v36  ;;  %v817_v53 = vmul.f32 %v692_v38, %v567_v23  ;;  %v328_v27 = vld [vmem:[#allocation6 + $0x358] sm:$0xff]  ;;  %v451_v28 = vld [vmem:[#allocation8 + $0x348] sm:$0xff] }
  0xd1   :  { %v928_v41 = vadd.f32 %v927_v34, %v804_v26  ;;  %v195_v34 = vld [vmem:[#allocation3 + $0x318] sm:$0xff] }
  0xd2   :  { %v570_v44 = vsub.f32 %v195_v34, %v320_v35  ;;  %v694_v52 = vmul.f32 %v569_v37, %v444_v43  ;;  %v818_v60 = vmul.f32 %v693_v45, %v568_v30  ;;  %v329_v34 = vld [vmem:[#allocation6 + $0x360] sm:$0xff]  ;;  %v452_v35 = vld [vmem:[#allocation8 + $0x350] sm:$0xff] }
  0xd3   :  { %v929_v48 = vadd.f32 %v928_v41, %v805_v33  ;;  %v196_v41 = vld [vmem:[#allocation3 + $0x320] sm:$0xff] }
  0xd4   :  { %v571_v51 = vsub.f32 %v196_v41, %v321_v42  ;;  %v695_v59 = vmul.f32 %v570_v44, %v445_v50  ;;  %v819_v3 = vmul.f32 %v694_v52, %v569_v37  ;;  %v330_v41 = vld [vmem:[#allocation6 + $0x368] sm:$0xff]  ;;  %v453_v42 = vld [vmem:[#allocation8 + $0x358] sm:$0xff] }
  0xd5   :  { %v930_v55 = vadd.f32 %v929_v48, %v806_v40  ;;  %v197_v48 = vld [vmem:[#allocation3 + $0x328] sm:$0xff] }
  0xd6   :  { %v572_v58 = vsub.f32 %v197_v48, %v322_v49  ;;  %v696_v2 = vmul.f32 %v571_v51, %v446_v57  ;;  %v820_v10 = vmul.f32 %v695_v59, %v570_v44  ;;  %v331_v48 = vld [vmem:[#allocation6 + $0x370] sm:$0xff]  ;;  %v454_v49 = vld [vmem:[#allocation8 + $0x360] sm:$0xff] }
  0xd7   :  { %v931_v62 = vadd.f32 %v930_v55, %v807_v47  ;;  %v198_v55 = vld [vmem:[#allocation3 + $0x330] sm:$0xff] }
  0xd8   :  { %v573_v1 = vsub.f32 %v198_v55, %v323_v56  ;;  %v697_v9 = vmul.f32 %v572_v58, %v447_v0  ;;  %v821_v17 = vmul.f32 %v696_v2, %v571_v51  ;;  %v332_v55 = vld [vmem:[#allocation6 + $0x378] sm:$0xff]  ;;  %v455_v56 = vld [vmem:[#allocation8 + $0x368] sm:$0xff] }
  0xd9   :  { %v932_v5 = vadd.f32 %v931_v62, %v808_v54  ;;  %v199_v62 = vld [vmem:[#allocation3 + $0x338] sm:$0xff] }
  0xda   :  { %v574_v8 = vsub.f32 %v199_v62, %v324_v63  ;;  %v698_v16 = vmul.f32 %v573_v1, %v448_v7  ;;  %v822_v24 = vmul.f32 %v697_v9, %v572_v58  ;;  %v333_v62 = vld [vmem:[#allocation6 + $0x380] sm:$0xff]  ;;  %v456_v63 = vld [vmem:[#allocation8 + $0x370] sm:$0xff] }
  0xdb   :  { %v933_v12 = vadd.f32 %v932_v5, %v809_v61  ;;  %v200_v5 = vld [vmem:[#allocation3 + $0x340] sm:$0xff] }
  0xdc   :  { %v575_v15 = vsub.f32 %v200_v5, %v325_v6  ;;  %v699_v23 = vmul.f32 %v574_v8, %v449_v14  ;;  %v823_v31 = vmul.f32 %v698_v16, %v573_v1  ;;  %v334_v5 = vld [vmem:[#allocation6 + $0x388] sm:$0xff]  ;;  %v457_v6 = vld [vmem:[#allocation8 + $0x378] sm:$0xff] }
  0xdd   :  { %v934_v19 = vadd.f32 %v933_v12, %v810_v4  ;;  %v201_v12 = vld [vmem:[#allocation3 + $0x348] sm:$0xff] }
  0xde   :  { %v576_v22 = vsub.f32 %v201_v12, %v326_v13  ;;  %v700_v30 = vmul.f32 %v575_v15, %v450_v21  ;;  %v824_v38 = vmul.f32 %v699_v23, %v574_v8  ;;  %v335_v12 = vld [vmem:[#allocation6 + $0x390] sm:$0xff]  ;;  %v458_v13 = vld [vmem:[#allocation8 + $0x380] sm:$0xff] }
  0xdf   :  { %v935_v26 = vadd.f32 %v934_v19, %v811_v11  ;;  %v202_v19 = vld [vmem:[#allocation3 + $0x350] sm:$0xff] }
  0xe0   :  { %v577_v29 = vsub.f32 %v202_v19, %v327_v20  ;;  %v701_v37 = vmul.f32 %v576_v22, %v451_v28  ;;  %v825_v45 = vmul.f32 %v700_v30, %v575_v15  ;;  %v336_v19 = vld [vmem:[#allocation6 + $0x398] sm:$0xff]  ;;  %v459_v20 = vld [vmem:[#allocation8 + $0x388] sm:$0xff] }
  0xe1   :  { %v936_v33 = vadd.f32 %v935_v26, %v812_v18  ;;  %v203_v26 = vld [vmem:[#allocation3 + $0x358] sm:$0xff] }
  0xe2   :  { %v578_v36 = vsub.f32 %v203_v26, %v328_v27  ;;  %v702_v44 = vmul.f32 %v577_v29, %v452_v35  ;;  %v826_v52 = vmul.f32 %v701_v37, %v576_v22  ;;  %v337_v26 = vld [vmem:[#allocation6 + $0x3a0] sm:$0xff]  ;;  %v460_v27 = vld [vmem:[#allocation8 + $0x390] sm:$0xff] }
  0xe3   :  { %v937_v40 = vadd.f32 %v936_v33, %v813_v25  ;;  %v204_v33 = vld [vmem:[#allocation3 + $0x360] sm:$0xff] }
  0xe4   :  { %v579_v43 = vsub.f32 %v204_v33, %v329_v34  ;;  %v703_v51 = vmul.f32 %v578_v36, %v453_v42  ;;  %v827_v59 = vmul.f32 %v702_v44, %v577_v29  ;;  %v338_v33 = vld [vmem:[#allocation6 + $0x3a8] sm:$0xff]  ;;  %v461_v34 = vld [vmem:[#allocation8 + $0x398] sm:$0xff] }
  0xe5   :  { %v938_v47 = vadd.f32 %v937_v40, %v814_v32  ;;  %v205_v40 = vld [vmem:[#allocation3 + $0x368] sm:$0xff] }
  0xe6   :  { %v580_v50 = vsub.f32 %v205_v40, %v330_v41  ;;  %v704_v58 = vmul.f32 %v579_v43, %v454_v49  ;;  %v828_v2 = vmul.f32 %v703_v51, %v578_v36  ;;  %v339_v40 = vld [vmem:[#allocation6 + $0x3b0] sm:$0xff]  ;;  %v462_v41 = vld [vmem:[#allocation8 + $0x3a0] sm:$0xff] }
  0xe7   :  { %v939_v54 = vadd.f32 %v938_v47, %v815_v39  ;;  %v206_v47 = vld [vmem:[#allocation3 + $0x370] sm:$0xff] }
  0xe8   :  { %v581_v57 = vsub.f32 %v206_v47, %v331_v48  ;;  %v705_v1 = vmul.f32 %v580_v50, %v455_v56  ;;  %v829_v9 = vmul.f32 %v704_v58, %v579_v43  ;;  %v340_v47 = vld [vmem:[#allocation6 + $0x3b8] sm:$0xff]  ;;  %v463_v48 = vld [vmem:[#allocation8 + $0x3a8] sm:$0xff] }
  0xe9   :  { %v940_v61 = vadd.f32 %v939_v54, %v816_v46  ;;  %v207_v54 = vld [vmem:[#allocation3 + $0x378] sm:$0xff] }
  0xea   :  { %v582_v0 = vsub.f32 %v207_v54, %v332_v55  ;;  %v706_v8 = vmul.f32 %v581_v57, %v456_v63  ;;  %v830_v16 = vmul.f32 %v705_v1, %v580_v50  ;;  %v341_v54 = vld [vmem:[#allocation6 + $0x3c0] sm:$0xff]  ;;  %v464_v55 = vld [vmem:[#allocation8 + $0x3b0] sm:$0xff] }
  0xeb   :  { %v941_v4 = vadd.f32 %v940_v61, %v817_v53  ;;  %v208_v61 = vld [vmem:[#allocation3 + $0x380] sm:$0xff] }
  0xec   :  { %v583_v7 = vsub.f32 %v208_v61, %v333_v62  ;;  %v707_v15 = vmul.f32 %v582_v0, %v457_v6  ;;  %v831_v23 = vmul.f32 %v706_v8, %v581_v57  ;;  %v342_v61 = vld [vmem:[#allocation6 + $0x3c8] sm:$0xff]  ;;  %v465_v62 = vld [vmem:[#allocation8 + $0x3b8] sm:$0xff] }
  0xed   :  { %v942_v11 = vadd.f32 %v941_v4, %v818_v60  ;;  %v209_v4 = vld [vmem:[#allocation3 + $0x388] sm:$0xff] }
  0xee   :  { %v584_v14 = vsub.f32 %v209_v4, %v334_v5  ;;  %v708_v22 = vmul.f32 %v583_v7, %v458_v13  ;;  %v832_v30 = vmul.f32 %v707_v15, %v582_v0  ;;  %v343_v4 = vld [vmem:[#allocation6 + $0x3d0] sm:$0xff]  ;;  %v466_v5 = vld [vmem:[#allocation8 + $0x3c0] sm:$0xff] }
  0xef   :  { %v943_v18 = vadd.f32 %v942_v11, %v819_v3  ;;  %v210_v11 = vld [vmem:[#allocation3 + $0x390] sm:$0xff] }
  0xf0   :  { %v585_v21 = vsub.f32 %v210_v11, %v335_v12  ;;  %v709_v29 = vmul.f32 %v584_v14, %v459_v20  ;;  %v833_v37 = vmul.f32 %v708_v22, %v583_v7  ;;  %v344_v11 = vld [vmem:[#allocation6 + $0x3d8] sm:$0xff]  ;;  %v467_v12 = vld [vmem:[#allocation8 + $0x3c8] sm:$0xff] }
  0xf1   :  { %v944_v25 = vadd.f32 %v943_v18, %v820_v10  ;;  %v211_v18 = vld [vmem:[#allocation3 + $0x398] sm:$0xff] }
  0xf2   :  { %v586_v28 = vsub.f32 %v211_v18, %v336_v19  ;;  %v710_v36 = vmul.f32 %v585_v21, %v460_v27  ;;  %v834_v44 = vmul.f32 %v709_v29, %v584_v14  ;;  %v345_v18 = vld [vmem:[#allocation6 + $0x3e0] sm:$0xff]  ;;  %v468_v19 = vld [vmem:[#allocation8 + $0x3d0] sm:$0xff]  ;;  %v470_v29 = vld [vmem:[#allocation8 + $0x3e0] sm:$0xff] }
  0xf3   :  { %v945_v32 = vadd.f32 %v944_v25, %v821_v17  ;;  %v212_v25 = vld [vmem:[#allocation3 + $0x3a0] sm:$0xff] }
  0xf4   :  { %v587_v35 = vsub.f32 %v212_v25, %v337_v26  ;;  %v711_v43 = vmul.f32 %v586_v28, %v461_v34  ;;  %v835_v51 = vmul.f32 %v710_v36, %v585_v21 }
  0xf5   :  { %v946_v39 = vadd.f32 %v945_v32, %v822_v24  ;;  %v213_v32 = vld [vmem:[#allocation3 + $0x3a8] sm:$0xff] }
  0xf6   :  { %v588_v42 = vsub.f32 %v213_v32, %v338_v33  ;;  %v712_v50 = vmul.f32 %v587_v35, %v462_v41  ;;  %v836_v58 = vmul.f32 %v711_v43, %v586_v28 }
  0xf7   :  { %v947_v46 = vadd.f32 %v946_v39, %v823_v31  ;;  %v214_v39 = vld [vmem:[#allocation3 + $0x3b0] sm:$0xff] }
  0xf8   :  { %v589_v49 = vsub.f32 %v214_v39, %v339_v40  ;;  %v713_v57 = vmul.f32 %v588_v42, %v463_v48  ;;  %v837_v1 = vmul.f32 %v712_v50, %v587_v35 }
  0xf9   :  { %v948_v53 = vadd.f32 %v947_v46, %v824_v38  ;;  %v215_v46 = vld [vmem:[#allocation3 + $0x3b8] sm:$0xff] }
  0xfa   :  { %v590_v56 = vsub.f32 %v215_v46, %v340_v47  ;;  %v714_v0 = vmul.f32 %v589_v49, %v464_v55  ;;  %v838_v8 = vmul.f32 %v713_v57, %v588_v42 }
  0xfb   :  { %v949_v60 = vadd.f32 %v948_v53, %v825_v45  ;;  %v216_v53 = vld [vmem:[#allocation3 + $0x3c0] sm:$0xff] }
  0xfc   :  { %v591_v63 = vsub.f32 %v216_v53, %v341_v54  ;;  %v715_v7 = vmul.f32 %v590_v56, %v465_v62  ;;  %v839_v15 = vmul.f32 %v714_v0, %v589_v49 }
  0xfd   :  { %v950_v3 = vadd.f32 %v949_v60, %v826_v52  ;;  %v217_v60 = vld [vmem:[#allocation3 + $0x3c8] sm:$0xff] }
  0xfe   :  { %v592_v6 = vsub.f32 %v217_v60, %v342_v61  ;;  %v716_v14 = vmul.f32 %v591_v63, %v466_v5  ;;  %v840_v22 = vmul.f32 %v715_v7, %v590_v56 }
  0xff   :  { %v951_v10 = vadd.f32 %v950_v3, %v827_v59  ;;  %v218_v3 = vld [vmem:[#allocation3 + $0x3d0] sm:$0xff] }
 0x100   :  { %v593_v13 = vsub.f32 %v218_v3, %v343_v4  ;;  %v717_v21 = vmul.f32 %v592_v6, %v467_v12  ;;  %v841_v27 = vmul.f32 %v716_v14, %v591_v63 }
 0x101   :  { %v952_v17 = vadd.f32 %v951_v10, %v828_v2  ;;  %v219_v10 = vld [vmem:[#allocation3 + $0x3d8] sm:$0xff] }
 0x102   :  { %v594_v20 = vsub.f32 %v219_v10, %v344_v11  ;;  %v718_v26 = vmul.f32 %v593_v13, %v468_v19 }
 0x103   :  { %v953_v24 = vadd.f32 %v952_v17, %v829_v9  ;;  %v220_v17 = vld [vmem:[#allocation3 + $0x3e0] sm:$0xff] }
 0x104   :  { %v595_v25 = vsub.f32 %v220_v17, %v345_v18  ;;  %v843_v34 = vmul.f32 %v718_v26, %v593_v13 }
 0x105   :  { %v954_v31 = vadd.f32 %v953_v24, %v830_v16  ;;  %v469_v24 = vld [vmem:[#allocation8 + $0x3d8] sm:$0xff] }
 0x106   :  { %v720_v33 = vmul.f32 %v595_v25, %v470_v29 }
 0x107   :  { %v955_v38 = vadd.f32 %v954_v31, %v831_v23  ;;  %v842_v31 = vmul.f32 %v717_v21, %v592_v6 }
 0x109   :  { %v956_v45 = vadd.f32 %v955_v38, %v832_v30  ;;  %v719_v30 = vmul.f32 %v594_v20, %v469_v24  ;;  %v845_v38 = vmul.f32 %v720_v33, %v595_v25 }
 0x10b   :  { %v957_v52 = vadd.f32 %v956_v45, %v833_v37  ;;  %v844_v36 = vmul.f32 %v719_v30, %v594_v20 }
 0x10d   :  { %v958_v59 = vadd.f32 %v957_v52, %v834_v44 }
 0x10f   :  { %v959_v2 = vadd.f32 %v958_v59, %v835_v51 }
 0x111   :  { %v960_v9 = vadd.f32 %v959_v2, %v836_v58 }
 0x113   :  { %v961_v16 = vadd.f32 %v960_v9, %v837_v1 }
 0x115   :  { %v962_v23 = vadd.f32 %v961_v16, %v838_v8 }
 0x117   :  { %v963_v28 = vadd.f32 %v962_v23, %v839_v15 }
 0x119   :  { %v964_v32 = vadd.f32 %v963_v28, %v840_v22 }
 0x11b   :  { %v965_v35 = vadd.f32 %v964_v32, %v841_v27 }
 0x11d   :  { %v966_v37 = vadd.f32 %v965_v35, %v842_v31 }
 0x11f   :  { %v967_v39 = vadd.f32 %v966_v37, %v843_v34 }
 0x121   :  { %v968_v40 = vadd.f32 %v967_v39, %v844_v36 }
 0x123   :  { %v969_v41 = vadd.f32 %v968_v40, %v845_v38 }
 0x125   :  { %978 = vadd.xlane.f32.xlu0 %v969_v41 }
 0x1ae   :  { %v979_v42 = vpop.xlane.xlu0 %978 }
 0x1af   :  { %v980_v43 = vrot.slane %v979_v42, 4 }
 0x1b1   :  { %v981_v44 = vadd.f32 %v980_v43, %v979_v42 }
 0x1b3   :  { %v982_v45 = vrot.slane %v981_v44, 2 }
 0x1b5   :  { %v983_v46 = vadd.f32 %v982_v45, %v981_v44 }
 0x1b7   :  { %v984_v47 = vrot.slane %v983_v46, 1 }
 0x1b9   :  { %v985_v48 = vadd.f32 %v984_v47, %v983_v46 }
 0x1bb   :  { %1010 = vpush %v985_v48 }
 0x1ec   :  { %s1011_s0 = spop %1010 }
 0x1ed   :  { %988 = sst [smem:[#allocation9]] %s1011_s0 }
 0x1ee   :  { %996 = dma.smem_to_hbm %s1097_s2, 16, %s1133_s3, [#allocation5]  }
 0x1ef   :  { %1090 = dma.done.wait [#allocation5], 16  }
 0x1f0   :  { %1091 = vsyncadd [#allocation5], 4294967280 }
 0x1f1   :  { %1000 = sfence }
 0x1f2   :  { %1001 = vsyncpa [#allocation4], 1 }
 0x1f3   :  { %1002 = vsyncpa [#allocation7], 1 }
 0x1f4   :  { %1003 = vsyncpa [#allocation5], 1 }

</bundles_post_ra>
